<compile_context>
chip_gen: v6e
topology: v6e:2x2x1
jax: 0.10.0
libtpu: 0.0.40
codegen_flags: <defaults>
</compile_context>

<pallas_src>
import functools
import math

import jax
import jax.numpy as jnp
import numpy as np
from jax.experimental import pallas as pl
from jax.experimental.pallas import tpu as pltpu

EPS = 1e-12
NTAPS = 9  # 3x3 kernel


# --------------------------------------------------------------------------- #
# Fused Conv2dSubsampling kernel:
#   relu(conv1) -> relu(conv2) -> Linear -> x*sqrt(D) + pos_enc
# One grid step per batch element.
# --------------------------------------------------------------------------- #
def _subsample_kernel(p1_ref, w1_ref, b1_ref, gsel_ref, w2_ref, b2_ref,
                      wout_ref, bout_ref, pe_ref, o_ref, *, C, T2, F2, D):
    xscale = math.sqrt(float(D))

    p1 = p1_ref[0]                                               # (T1*F1, 9)
    y1 = jnp.dot(p1, w1_ref[...], preferred_element_type=jnp.float32) + b1_ref[...]
    y1 = jnp.maximum(y1, 0.0)                                    # (T1*F1, C)

    # conv2 as 9 taps: gather rows with a 0/1 selection GEMM, then (C,C) GEMM.
    acc = jnp.zeros((T2 * F2, C), jnp.float32) + b2_ref[...]     # rows: f2*T2 + t2
    for t in range(NTAPS):
        g = jnp.dot(gsel_ref[t], y1, preferred_element_type=jnp.float32)
        acc = acc + jnp.dot(g, w2_ref[t * C:(t + 1) * C, :],
                            preferred_element_type=jnp.float32)
    y2 = jnp.maximum(acc, 0.0)                                   # (T2*F2, C)

    # Output linear, decomposed over the F2 frequency blocks (rows are f2-major
    # so the slices are contiguous).  Feature flatten order = f2*C + c (a
    # permutation of the PyTorch c*F2 + f order; weights are synthetic).
    out = jnp.zeros((T2, D), jnp.float32) + bout_ref[...]
    for f in range(F2):
        out = out + jnp.dot(y2[f * T2:(f + 1) * T2, :],
                            wout_ref[f * C:(f + 1) * C, :],
                            preferred_element_type=jnp.float32)

    o_ref[0] = out * xscale + pe_ref[...]


def _im2col_first(x):
    """im2col for conv1 (single input channel), done wrapper-side on raw input."""
    B, T, F = x.shape
    T1 = (T - 3) // 2 + 1
    F1 = (F - 3) // 2 + 1
    cols = []
    for i in range(3):
        for j in range(3):
            cols.append(x[:, i:i + 2 * (T1 - 1) + 1:2, j:j + 2 * (F1 - 1) + 1:2])
    p = jnp.stack(cols, axis=-1)                  # (B, T1, F1, 9), tap = i*3+j
    return p.reshape(B, T1 * F1, 9), T1, F1


def _conv2_gather_matrices(T1, F1, T2, F2):
    """0/1 matrices selecting conv2's im2col rows out of the (T1*F1, C) conv1 out."""
    g = np.zeros((NTAPS, T2 * F2, T1 * F1), np.float32)
    for i in range(3):
        for j in range(3):
            t = i * 3 + j
            for t2 in range(T2):
                for f2 in range(F2):
                    r = f2 * T2 + t2                       # f2-major output rows
                    src = (2 * t2 + i) * F1 + (2 * f2 + j)
                    g[t, r, src] = 1.0
    return jnp.asarray(g)


def positional_encoding(T, D):
    pos = jnp.arange(T, dtype=jnp.float32)[:, None]
    div = jnp.exp(jnp.arange(0, D, 2, dtype=jnp.float32) * (-math.log(10000.0) / D))
    pe = jnp.zeros((T, D), jnp.float32)
    pe = pe.at[:, 0::2].set(jnp.sin(pos * div))
    pe = pe.at[:, 1::2].set(jnp.cos(pos * div))
    return pe


def conv2d_subsampling(xs, masks, params):
    B, T, F = xs.shape
    C = params["conv1_w"].shape[1]
    D = params["out_w"].shape[1]

    p1, T1, F1 = _im2col_first(xs)
    T2 = (T1 - 3) // 2 + 1
    F2 = (F1 - 3) // 2 + 1
    gsel = _conv2_gather_matrices(T1, F1, T2, F2)
    pe = positional_encoding(T2, D)

    out = pl.pallas_call(
        functools.partial(_subsample_kernel, C=C, T2=T2, F2=F2, D=D),
        grid=(B,),
        out_shape=jax.ShapeDtypeStruct((B, T2, D), jnp.float32),
        in_specs=[
            pl.BlockSpec((1, T1 * F1, 9), lambda b: (b, 0, 0)),
            pl.BlockSpec((9, C), lambda b: (0, 0)),
            pl.BlockSpec((1, C), lambda b: (0, 0)),
            pl.BlockSpec((NTAPS, T2 * F2, T1 * F1), lambda b: (0, 0, 0)),
            pl.BlockSpec((NTAPS * C, C), lambda b: (0, 0)),
            pl.BlockSpec((1, C), lambda b: (0, 0)),
            pl.BlockSpec((F2 * C, D), lambda b: (0, 0)),
            pl.BlockSpec((1, D), lambda b: (0, 0)),
            pl.BlockSpec((T2, D), lambda b: (0, 0)),
        ],
        out_specs=pl.BlockSpec((1, T2, D), lambda b: (b, 0, 0)),
        compiler_params=pltpu.CompilerParams(dimension_semantics=("parallel",)),
    )(p1, params["conv1_w"], params["conv1_b"], gsel, params["conv2_w"],
      params["conv2_b"], params["out_w"], params["out_b"], pe)

    new_masks = masks[:, :, :-2:2][:, :, :-2:2]
    return out, new_masks


# --------------------------------------------------------------------------- #
# Fused encoder stack kernel: all layers + final after_norm in ONE pallas_call.
# grid=(L,) sequential; per-layer weights streamed; activation in VMEM scratch.
# --------------------------------------------------------------------------- #
def _encoder_stack_kernel(x_ref, bm_ref, ln1w, ln1b, wqkv, bqkv, wo, bo,
                          ln2w, ln2b, w1, b1, w2, b2, afw, afb,
                          o_ref, x_sc, *, H, mm_dtype):
    l = pl.program_id(0)
    nl = pl.num_programs(0)
    BT, D = x_sc.shape
    DH = D // H
    qscale = 1.0 / math.sqrt(DH)
    neg = jnp.finfo(jnp.float32).min

    def mm(a, b):
        return jnp.dot(a.astype(mm_dtype), b.astype(mm_dtype),
                       preferred_element_type=jnp.float32)

    def ln(v, w, b):
        mu = jnp.mean(v, axis=-1, keepdims=True)
        var = jnp.mean(jnp.square(v - mu), axis=-1, keepdims=True)
        return (v - mu) * jax.lax.rsqrt(var + EPS) * w + b

    @pl.when(l == 0)
    def _():
        x_sc[...] = x_ref[...]

    x = x_sc[...]                                   # (BT, D)
    bm = bm_ref[...] > 0.0                          # (BT, BT) block-diag key mask

    # ---- self-attention block (pre-LN) ----------------------------------- #
    xn = ln(x, ln1w[0], ln1b[0])
    qkv = mm(xn, wqkv[0]) + bqkv[0]                 # single fused QKV GEMM
    q = qkv[:, :D] * qscale
    k = qkv[:, D:2 * D]
    v = qkv[:, 2 * D:]

    lane = jax.lax.broadcasted_iota(jnp.int32, (1, D), 1)
    ctx = jnp.zeros((BT, D), jnp.float32)
    for h in range(H):                               # full-width MXU ops per head
        head = (lane >= h * DH) & (lane < (h + 1) * DH)
        qh = jnp.where(head, q, 0.0)
        vh = jnp.where(head, v, 0.0)
        s = jax.lax.dot_general(qh.astype(mm_dtype), k.astype(mm_dtype),
                                (((1,), (1,)), ((), ())),
                                preferred_element_type=jnp.float32)   # (BT, BT)
        s = jnp.where(bm, s, neg)
        smax = jnp.max(s, axis=-1, keepdims=True)
        e = jnp.exp(s - smax)
        p = e * pl.reciprocal(jnp.sum(e, axis=-1, keepdims=True), approx=True)
        p = jnp.where(bm, p, 0.0)
        ctx = ctx + mm(p, vh)                        # heads land in disjoint lanes

    x = x + mm(ctx, wo[0]) + bo[0]                   # single WO GEMM over B*T rows

    # ---- position-wise feed-forward block (pre-LN) ------------------------ #
    xn2 = ln(x, ln2w[0], ln2b[0])
    h1 = jnp.maximum(mm(xn2, w1[0]) + b1[0], 0.0)
    x = x + mm(h1, w2[0]) + b2[0]

    x_sc[...] = x                                    # carry to next layer

    @pl.when(l == nl - 1)
    def _():
        o_ref[...] = ln(x, afw[...], afb[...])       # fused final after_norm


def encoder_stack(x2d, bmask, lp, after_w, after_b, heads,
                  mm_dtype=jnp.float32):
    BT, D = x2d.shape
    L = lp["wqkv"].shape[0]
    Dff = lp["w1"].shape[2]

    def const_spec(shape):
        return pl.BlockSpec(shape, lambda l: (0,) * len(shape))

    def layer_spec(shape):
        return pl.BlockSpec((1,) + shape, lambda l: (l,) + (0,) * len(shape))

    return pl.pallas_call(
        functools.partial(_encoder_stack_kernel, H=heads, mm_dtype=mm_dtype),
        grid=(L,),
        out_shape=jax.ShapeDtypeStruct((BT, D), jnp.float32),
        in_specs=[
            const_spec((BT, D)),
            const_spec((BT, BT)),
            layer_spec((1, D)), layer_spec((1, D)),            # ln1
            layer_spec((D, 3 * D)), layer_spec((1, 3 * D)),    # fused qkv
            layer_spec((D, D)), layer_spec((1, D)),            # out proj
            layer_spec((1, D)), layer_spec((1, D)),            # ln2
            layer_spec((D, Dff)), layer_spec((1, Dff)),        # ffn w1
            layer_spec((Dff, D)), layer_spec((1, D)),          # ffn w2
            const_spec((1, D)), const_spec((1, D)),            # after_norm
        ],
        out_specs=const_spec((BT, D)),
        scratch_shapes=[pltpu.VMEM((BT, D), jnp.float32)],
        compiler_params=pltpu.CompilerParams(
            dimension_semantics=("arbitrary",),
            vmem_limit_bytes=32 * 1024 * 1024),
    )(x2d, bmask, lp["ln1w"], lp["ln1b"], lp["wqkv"], lp["bqkv"],
      lp["wo"], lp["bo"], lp["ln2w"], lp["ln2b"],
      lp["w1"], lp["b1"], lp["w2"], lp["b2"], after_w, after_b)


# --------------------------------------------------------------------------- #
# Parameter init (deterministic, synthetic) and full forward.
# --------------------------------------------------------------------------- #
def init_params(key, idim, d_model, d_ff, num_blocks):
    f1 = (idim - 3) // 2 + 1
    f2 = (f1 - 3) // 2 + 1
    kit = iter(jax.random.split(key, 32))

    def dense(shape, scale=0.02):
        return scale * jax.random.normal(next(kit), shape, jnp.float32)

    L = num_blocks
    params = {
        "conv1_w": dense((NTAPS, d_model)),
        "conv1_b": dense((1, d_model)),
        "conv2_w": dense((NTAPS * d_model, d_model)),
        "conv2_b": dense((1, d_model)),
        "out_w": dense((f2 * d_model, d_model)),
        "out_b": dense((1, d_model)),
        "after_w": jnp.ones((1, d_model), jnp.float32),
        "after_b": jnp.zeros((1, d_model), jnp.float32),
        "layers": {
            "ln1w": jnp.ones((L, 1, d_model), jnp.float32),
            "ln1b": jnp.zeros((L, 1, d_model), jnp.float32),
            "wqkv": dense((L, d_model, 3 * d_model)),
            "bqkv": dense((L, 1, 3 * d_model)),
            "wo": dense((L, d_model, d_model)),
            "bo": dense((L, 1, d_model)),
            "ln2w": jnp.ones((L, 1, d_model), jnp.float32),
            "ln2b": jnp.zeros((L, 1, d_model), jnp.float32),
            "w1": dense((L, d_model, d_ff)),
            "b1": dense((L, 1, d_ff)),
            "w2": dense((L, d_ff, d_model)),
            "b2": dense((L, 1, d_model)),
        },
    }
    return params


def transformer_encoder_lm_forward(xs, masks, params, heads,
                                   mm_dtype=jnp.float32):
    # Set mm_dtype=jnp.bfloat16 on v6e/v7x for MXU-native matmuls.
    x, new_masks = conv2d_subsampling(xs, masks, params)      # fused front-end
    B, T2, D = x.shape

    key_valid = new_masks[:, 0, :].reshape(B * T2)
    batch_id = jnp.repeat(jnp.arange(B, dtype=jnp.int32), T2)
    bmask = ((batch_id[:, None] == batch_id[None, :])
             & key_valid[None, :]).astype(jnp.float32)        # (B*T2, B*T2)

    out2d = encoder_stack(x.reshape(B * T2, D), bmask, params["layers"],
                          params["after_w"], params["after_b"], heads, mm_dtype)
    return out2d.reshape(B, T2, D), new_masks


# --------------------------------------------------------------------------- #
# Pure-JAX reference (same synthetic weight layout) for a correctness check.
# --------------------------------------------------------------------------- #
def _reference_forward(xs, masks, params, heads):
    B, T, F = xs.shape
    D = params["conv1_w"].shape[1]

    p1, T1, F1 = _im2col_first(xs)
    y1 = jax.nn.relu(p1 @ params["conv1_w"] + params["conv1_b"])
    y1 = y1.reshape(B, T1, F1, D)
    T2 = (T1 - 3) // 2 + 1
    F2 = (F1 - 3) // 2 + 1

    acc = jnp.zeros((B, T2, F2, D), jnp.float32) + params["conv2_b"].reshape(1, 1, 1, D)
    for i in range(3):
        for j in range(3):
            t = i * 3 + j
            w_t = params["conv2_w"][t * D:(t + 1) * D, :]
            sl = y1[:, i:i + 2 * T2:2, j:j + 2 * F2:2, :]
            acc = acc + jnp.einsum("btfc,cd->btfd", sl, w_t)
    y2 = jax.nn.relu(acc)

    out = jnp.zeros((B, T2, D), jnp.float32) + params["out_b"]
    for f in range(F2):
        out = out + y2[:, :, f, :] @ params["out_w"][f * D:(f + 1) * D, :]
    x = out * math.sqrt(float(D)) + positional_encoding(T2, D)[None]

    new_masks = masks[:, :, :-2:2][:, :, :-2:2]
    mask_b = new_masks[:, 0, :]
    lp = params["layers"]
    H = heads
    DH = D // H
    neg = jnp.finfo(jnp.float32).min

    def lnorm(v, w, b):
        mu = v.mean(-1, keepdims=True)
        var = ((v - mu) ** 2).mean(-1, keepdims=True)
        return (v - mu) / jnp.sqrt(var + EPS) * w + b

    L = lp["wqkv"].shape[0]
    for l in range(L):
        xn = lnorm(x, lp["ln1w"][l], lp["ln1b"][l])
        qkv = xn @ lp["wqkv"][l] + lp["bqkv"][l]
        q, k, v = qkv[..., :D], qkv[..., D:2 * D], qkv[..., 2 * D:]
        q = q.reshape(B, T2, H, DH).transpose(0, 2, 1, 3)
        k = k.reshape(B, T2, H, DH).transpose(0, 2, 1, 3)
        v = v.reshape(B, T2, H, DH).transpose(0, 2, 1, 3)
        s = jnp.einsum("bhqd,bhkd->bhqk", q, k) / math.sqrt(DH)
        mask4 = mask_b[:, None, None, :]
        s = jnp.where(mask4, s, neg)
        p = jax.nn.softmax(s, axis=-1)
        p = jnp.where(mask4, p, 0.0)
        ctx = jnp.einsum("bhqk,bhkd->bhqd", p, v).transpose(0, 2, 1, 3).reshape(B, T2, D)
        x = x + ctx @ lp["wo"][l] + lp["bo"][l]
        xn2 = lnorm(x, lp["ln2w"][l], lp["ln2b"][l])
        h1 = jax.nn.relu(xn2 @ lp["w1"][l] + lp["b1"][l])
        x = x + h1 @ lp["w2"][l] + lp["b2"][l]
    x = lnorm(x, params["after_w"], params["after_b"])
    return x, new_masks


if __name__ == "__main__":
    # Small shapes consistent with the module's forward.
    B, T, IDIM = 2, 30, 16
    D_MODEL, HEADS, D_FF, NUM_BLOCKS = 128, 4, 256, 2

    key = jax.random.PRNGKey(0)
    kx, kp = jax.random.split(key)
    xs = jax.random.normal(kx, (B, T, IDIM), jnp.float32)        # (#batch, time, idim)
    lengths = jnp.array([30, 14], dtype=jnp.int32)
    masks = (jnp.arange(T)[None, :] < lengths[:, None])[:, None, :]   # (B, 1, T) bool

    params = init_params(kp, IDIM, D_MODEL, D_FF, NUM_BLOCKS)

    out, out_masks = transformer_encoder_lm_forward(xs, masks, params, HEADS)
    jax.block_until_ready(out)

    T2 = ((T - 1) // 2 - 1) // 2
    assert out.shape == (B, T2, D_MODEL)
    assert out_masks.shape == (B, 1, T2)

    ref_out, _ = _reference_forward(xs, masks, params, HEADS)
    max_err = float(jnp.max(jnp.abs(out - ref_out)))
    assert max_err < 5e-2, f"kernel/reference mismatch: {max_err}"

    print("KERNEL_OK")
</pallas_src>

<mosaic_0001>
module attributes {stable_mosaic.version = 11 : i64} {
  func.func @_subsample_kernel(%arg0: i32, %arg1: memref<1x98x9xf32, #tpu.memory_space<vmem>>, %arg2: memref<9x128xf32, #tpu.memory_space<vmem>>, %arg3: memref<1x128xf32, #tpu.memory_space<vmem>>, %arg4: memref<9x18x98xf32, #tpu.memory_space<vmem>>, %arg5: memref<1152x128xf32, #tpu.memory_space<vmem>>, %arg6: memref<1x128xf32, #tpu.memory_space<vmem>>, %arg7: memref<384x128xf32, #tpu.memory_space<vmem>>, %arg8: memref<1x128xf32, #tpu.memory_space<vmem>>, %arg9: memref<6x128xf32, #tpu.memory_space<vmem>>, %arg10: memref<1x6x128xf32, #tpu.memory_space<vmem>>) attributes {dimension_semantics = [#tpu.dimension_semantics<parallel>], iteration_bounds = array<i64: 2>, scalar_prefetch = 0 : i64, scratch_operands = 0 : i64, tpu.core_type = #tpu.core_type<tc>, window_params = [{transform_indices = @transform_0, window_bounds = array<i64: 1, 98, 9>}, {pipeline_mode = #tpu.pipeline_mode<synchronous>, transform_indices = @transform_1, window_bounds = array<i64: 9, 128>}, {pipeline_mode = #tpu.pipeline_mode<synchronous>, transform_indices = @transform_2, window_bounds = array<i64: 1, 128>}, {pipeline_mode = #tpu.pipeline_mode<synchronous>, transform_indices = @transform_3, window_bounds = array<i64: 9, 18, 98>}, {pipeline_mode = #tpu.pipeline_mode<synchronous>, transform_indices = @transform_4, window_bounds = array<i64: 1152, 128>}, {pipeline_mode = #tpu.pipeline_mode<synchronous>, transform_indices = @transform_5, window_bounds = array<i64: 1, 128>}, {pipeline_mode = #tpu.pipeline_mode<synchronous>, transform_indices = @transform_6, window_bounds = array<i64: 384, 128>}, {pipeline_mode = #tpu.pipeline_mode<synchronous>, transform_indices = @transform_7, window_bounds = array<i64: 1, 128>}, {pipeline_mode = #tpu.pipeline_mode<synchronous>, transform_indices = @transform_8, window_bounds = array<i64: 6, 128>}, {transform_indices = @transform_9, window_bounds = array<i64: 1, 6, 128>}]} {
    %c0 = arith.constant 0 : index
    %c0_0 = arith.constant 0 : index
    %c0_1 = arith.constant 0 : index
    %0 = vector.load %arg1[%c0, %c0_0, %c0_1] : memref<1x98x9xf32, #tpu.memory_space<vmem>>, vector<1x98x9xf32>
    %1 = vector.shape_cast %0 : vector<1x98x9xf32> to vector<98x9xf32>
    %c0_2 = arith.constant 0 : index
    %c0_3 = arith.constant 0 : index
    %2 = vector.load %arg2[%c0_2, %c0_3] : memref<9x128xf32, #tpu.memory_space<vmem>>, vector<9x128xf32>
    %cst = arith.constant dense<0.000000e+00> : vector<98x128xf32>
    %3 = tpu.matmul %1, %2, %cst {dimension_numbers = #tpu.dot_dimension_numbers<[1], [0], [0], [1], [0, 0, 1, 1], [], []>} : vector<98x9xf32>, vector<9x128xf32>, vector<98x128xf32> -> vector<98x128xf32>
    %c0_4 = arith.constant 0 : index
    %c0_5 = arith.constant 0 : index
    %4 = vector.load %arg3[%c0_4, %c0_5] : memref<1x128xf32, #tpu.memory_space<vmem>>, vector<1x128xf32>
    %5 = vector.broadcast %4 : vector<1x128xf32> to vector<98x128xf32>
    %6 = arith.addf %3, %5 : vector<98x128xf32>
    %cst_6 = arith.constant 0.000000e+00 : f32
    %7 = vector.broadcast %cst_6 : f32 to vector<98x128xf32>
    %8 = arith.maximumf %6, %7 : vector<98x128xf32>
    %cst_7 = arith.constant 0.000000e+00 : f32
    %9 = vector.broadcast %cst_7 : f32 to vector<18x128xf32>
    %c0_8 = arith.constant 0 : index
    %c0_9 = arith.constant 0 : index
    %10 = vector.load %arg6[%c0_8, %c0_9] : memref<1x128xf32, #tpu.memory_space<vmem>>, vector<1x128xf32>
    %11 = vector.broadcast %10 : vector<1x128xf32> to vector<18x128xf32>
    %12 = arith.addf %9, %11 : vector<18x128xf32>
    %c0_10 = arith.constant 0 : index
    %c0_11 = arith.constant 0 : index
    %c0_12 = arith.constant 0 : index
    %13 = vector.load %arg4[%c0_10, %c0_11, %c0_12] : memref<9x18x98xf32, #tpu.memory_space<vmem>>, vector<1x18x98xf32>
    %14 = vector.shape_cast %13 : vector<1x18x98xf32> to vector<18x98xf32>
    %cst_13 = arith.constant dense<0.000000e+00> : vector<18x128xf32>
    %15 = tpu.matmul %14, %8, %cst_13 {dimension_numbers = #tpu.dot_dimension_numbers<[1], [0], [0], [1], [0, 0, 1, 1], [], []>} : vector<18x98xf32>, vector<98x128xf32>, vector<18x128xf32> -> vector<18x128xf32>
    %c0_14 = arith.constant 0 : index
    %c0_15 = arith.constant 0 : index
    %16 = vector.load %arg5[%c0_14, %c0_15] : memref<1152x128xf32, #tpu.memory_space<vmem>>, vector<128x128xf32>
    %cst_16 = arith.constant dense<0.000000e+00> : vector<18x128xf32>
    %17 = tpu.matmul %15, %16, %cst_16 {dimension_numbers = #tpu.dot_dimension_numbers<[1], [0], [0], [1], [0, 0, 1, 1], [], []>} : vector<18x128xf32>, vector<128x128xf32>, vector<18x128xf32> -> vector<18x128xf32>
    %18 = arith.addf %12, %17 : vector<18x128xf32>
    %c1 = arith.constant 1 : index
    %c0_17 = arith.constant 0 : index
    %c0_18 = arith.constant 0 : index
    %19 = vector.load %arg4[%c1, %c0_17, %c0_18] : memref<9x18x98xf32, #tpu.memory_space<vmem>>, vector<1x18x98xf32>
    %20 = vector.shape_cast %19 : vector<1x18x98xf32> to vector<18x98xf32>
    %cst_19 = arith.constant dense<0.000000e+00> : vector<18x128xf32>
    %21 = tpu.matmul %20, %8, %cst_19 {dimension_numbers = #tpu.dot_dimension_numbers<[1], [0], [0], [1], [0, 0, 1, 1], [], []>} : vector<18x98xf32>, vector<98x128xf32>, vector<18x128xf32> -> vector<18x128xf32>
    %c128 = arith.constant 128 : index
    %c0_20 = arith.constant 0 : index
    %22 = vector.load %arg5[%c128, %c0_20] : memref<1152x128xf32, #tpu.memory_space<vmem>>, vector<128x128xf32>
    %cst_21 = arith.constant dense<0.000000e+00> : vector<18x128xf32>
    %23 = tpu.matmul %21, %22, %cst_21 {dimension_numbers = #tpu.dot_dimension_numbers<[1], [0], [0], [1], [0, 0, 1, 1], [], []>} : vector<18x128xf32>, vector<128x128xf32>, vector<18x128xf32> -> vector<18x128xf32>
    %24 = arith.addf %18, %23 : vector<18x128xf32>
    %c2 = arith.constant 2 : index
    %c0_22 = arith.constant 0 : index
    %c0_23 = arith.constant 0 : index
    %25 = vector.load %arg4[%c2, %c0_22, %c0_23] : memref<9x18x98xf32, #tpu.memory_space<vmem>>, vector<1x18x98xf32>
    %26 = vector.shape_cast %25 : vector<1x18x98xf32> to vector<18x98xf32>
    %cst_24 = arith.constant dense<0.000000e+00> : vector<18x128xf32>
    %27 = tpu.matmul %26, %8, %cst_24 {dimension_numbers = #tpu.dot_dimension_numbers<[1], [0], [0], [1], [0, 0, 1, 1], [], []>} : vector<18x98xf32>, vector<98x128xf32>, vector<18x128xf32> -> vector<18x128xf32>
    %c256 = arith.constant 256 : index
    %c0_25 = arith.constant 0 : index
    %28 = vector.load %arg5[%c256, %c0_25] : memref<1152x128xf32, #tpu.memory_space<vmem>>, vector<128x128xf32>
    %cst_26 = arith.constant dense<0.000000e+00> : vector<18x128xf32>
    %29 = tpu.matmul %27, %28, %cst_26 {dimension_numbers = #tpu.dot_dimension_numbers<[1], [0], [0], [1], [0, 0, 1, 1], [], []>} : vector<18x128xf32>, vector<128x128xf32>, vector<18x128xf32> -> vector<18x128xf32>
    %30 = arith.addf %24, %29 : vector<18x128xf32>
    %c3 = arith.constant 3 : index
    %c0_27 = arith.constant 0 : index
    %c0_28 = arith.constant 0 : index
    %31 = vector.load %arg4[%c3, %c0_27, %c0_28] : memref<9x18x98xf32, #tpu.memory_space<vmem>>, vector<1x18x98xf32>
    %32 = vector.shape_cast %31 : vector<1x18x98xf32> to vector<18x98xf32>
    %cst_29 = arith.constant dense<0.000000e+00> : vector<18x128xf32>
    %33 = tpu.matmul %32, %8, %cst_29 {dimension_numbers = #tpu.dot_dimension_numbers<[1], [0], [0], [1], [0, 0, 1, 1], [], []>} : vector<18x98xf32>, vector<98x128xf32>, vector<18x128xf32> -> vector<18x128xf32>
    %c384 = arith.constant 384 : index
    %c0_30 = arith.constant 0 : index
    %34 = vector.load %arg5[%c384, %c0_30] : memref<1152x128xf32, #tpu.memory_space<vmem>>, vector<128x128xf32>
    %cst_31 = arith.constant dense<0.000000e+00> : vector<18x128xf32>
    %35 = tpu.matmul %33, %34, %cst_31 {dimension_numbers = #tpu.dot_dimension_numbers<[1], [0], [0], [1], [0, 0, 1, 1], [], []>} : vector<18x128xf32>, vector<128x128xf32>, vector<18x128xf32> -> vector<18x128xf32>
    %36 = arith.addf %30, %35 : vector<18x128xf32>
    %c4 = arith.constant 4 : index
    %c0_32 = arith.constant 0 : index
    %c0_33 = arith.constant 0 : index
    %37 = vector.load %arg4[%c4, %c0_32, %c0_33] : memref<9x18x98xf32, #tpu.memory_space<vmem>>, vector<1x18x98xf32>
    %38 = vector.shape_cast %37 : vector<1x18x98xf32> to vector<18x98xf32>
    %cst_34 = arith.constant dense<0.000000e+00> : vector<18x128xf32>
    %39 = tpu.matmul %38, %8, %cst_34 {dimension_numbers = #tpu.dot_dimension_numbers<[1], [0], [0], [1], [0, 0, 1, 1], [], []>} : vector<18x98xf32>, vector<98x128xf32>, vector<18x128xf32> -> vector<18x128xf32>
    %c512 = arith.constant 512 : index
    %c0_35 = arith.constant 0 : index
    %40 = vector.load %arg5[%c512, %c0_35] : memref<1152x128xf32, #tpu.memory_space<vmem>>, vector<128x128xf32>
    %cst_36 = arith.constant dense<0.000000e+00> : vector<18x128xf32>
    %41 = tpu.matmul %39, %40, %cst_36 {dimension_numbers = #tpu.dot_dimension_numbers<[1], [0], [0], [1], [0, 0, 1, 1], [], []>} : vector<18x128xf32>, vector<128x128xf32>, vector<18x128xf32> -> vector<18x128xf32>
    %42 = arith.addf %36, %41 : vector<18x128xf32>
    %c5 = arith.constant 5 : index
    %c0_37 = arith.constant 0 : index
    %c0_38 = arith.constant 0 : index
    %43 = vector.load %arg4[%c5, %c0_37, %c0_38] : memref<9x18x98xf32, #tpu.memory_space<vmem>>, vector<1x18x98xf32>
    %44 = vector.shape_cast %43 : vector<1x18x98xf32> to vector<18x98xf32>
    %cst_39 = arith.constant dense<0.000000e+00> : vector<18x128xf32>
    %45 = tpu.matmul %44, %8, %cst_39 {dimension_numbers = #tpu.dot_dimension_numbers<[1], [0], [0], [1], [0, 0, 1, 1], [], []>} : vector<18x98xf32>, vector<98x128xf32>, vector<18x128xf32> -> vector<18x128xf32>
    %c640 = arith.constant 640 : index
    %c0_40 = arith.constant 0 : index
    %46 = vector.load %arg5[%c640, %c0_40] : memref<1152x128xf32, #tpu.memory_space<vmem>>, vector<128x128xf32>
    %cst_41 = arith.constant dense<0.000000e+00> : vector<18x128xf32>
    %47 = tpu.matmul %45, %46, %cst_41 {dimension_numbers = #tpu.dot_dimension_numbers<[1], [0], [0], [1], [0, 0, 1, 1], [], []>} : vector<18x128xf32>, vector<128x128xf32>, vector<18x128xf32> -> vector<18x128xf32>
    %48 = arith.addf %42, %47 : vector<18x128xf32>
    %c6 = arith.constant 6 : index
    %c0_42 = arith.constant 0 : index
    %c0_43 = arith.constant 0 : index
    %49 = vector.load %arg4[%c6, %c0_42, %c0_43] : memref<9x18x98xf32, #tpu.memory_space<vmem>>, vector<1x18x98xf32>
    %50 = vector.shape_cast %49 : vector<1x18x98xf32> to vector<18x98xf32>
    %cst_44 = arith.constant dense<0.000000e+00> : vector<18x128xf32>
    %51 = tpu.matmul %50, %8, %cst_44 {dimension_numbers = #tpu.dot_dimension_numbers<[1], [0], [0], [1], [0, 0, 1, 1], [], []>} : vector<18x98xf32>, vector<98x128xf32>, vector<18x128xf32> -> vector<18x128xf32>
    %c768 = arith.constant 768 : index
    %c0_45 = arith.constant 0 : index
    %52 = vector.load %arg5[%c768, %c0_45] : memref<1152x128xf32, #tpu.memory_space<vmem>>, vector<128x128xf32>
    %cst_46 = arith.constant dense<0.000000e+00> : vector<18x128xf32>
    %53 = tpu.matmul %51, %52, %cst_46 {dimension_numbers = #tpu.dot_dimension_numbers<[1], [0], [0], [1], [0, 0, 1, 1], [], []>} : vector<18x128xf32>, vector<128x128xf32>, vector<18x128xf32> -> vector<18x128xf32>
    %54 = arith.addf %48, %53 : vector<18x128xf32>
    %c7 = arith.constant 7 : index
    %c0_47 = arith.constant 0 : index
    %c0_48 = arith.constant 0 : index
    %55 = vector.load %arg4[%c7, %c0_47, %c0_48] : memref<9x18x98xf32, #tpu.memory_space<vmem>>, vector<1x18x98xf32>
    %56 = vector.shape_cast %55 : vector<1x18x98xf32> to vector<18x98xf32>
    %cst_49 = arith.constant dense<0.000000e+00> : vector<18x128xf32>
    %57 = tpu.matmul %56, %8, %cst_49 {dimension_numbers = #tpu.dot_dimension_numbers<[1], [0], [0], [1], [0, 0, 1, 1], [], []>} : vector<18x98xf32>, vector<98x128xf32>, vector<18x128xf32> -> vector<18x128xf32>
    %c896 = arith.constant 896 : index
    %c0_50 = arith.constant 0 : index
    %58 = vector.load %arg5[%c896, %c0_50] : memref<1152x128xf32, #tpu.memory_space<vmem>>, vector<128x128xf32>
    %cst_51 = arith.constant dense<0.000000e+00> : vector<18x128xf32>
    %59 = tpu.matmul %57, %58, %cst_51 {dimension_numbers = #tpu.dot_dimension_numbers<[1], [0], [0], [1], [0, 0, 1, 1], [], []>} : vector<18x128xf32>, vector<128x128xf32>, vector<18x128xf32> -> vector<18x128xf32>
    %60 = arith.addf %54, %59 : vector<18x128xf32>
    %c8 = arith.constant 8 : index
    %c0_52 = arith.constant 0 : index
    %c0_53 = arith.constant 0 : index
    %61 = vector.load %arg4[%c8, %c0_52, %c0_53] : memref<9x18x98xf32, #tpu.memory_space<vmem>>, vector<1x18x98xf32>
    %62 = vector.shape_cast %61 : vector<1x18x98xf32> to vector<18x98xf32>
    %cst_54 = arith.constant dense<0.000000e+00> : vector<18x128xf32>
    %63 = tpu.matmul %62, %8, %cst_54 {dimension_numbers = #tpu.dot_dimension_numbers<[1], [0], [0], [1], [0, 0, 1, 1], [], []>} : vector<18x98xf32>, vector<98x128xf32>, vector<18x128xf32> -> vector<18x128xf32>
    %c1024 = arith.constant 1024 : index
    %c0_55 = arith.constant 0 : index
    %64 = vector.load %arg5[%c1024, %c0_55] : memref<1152x128xf32, #tpu.memory_space<vmem>>, vector<128x128xf32>
    %cst_56 = arith.constant dense<0.000000e+00> : vector<18x128xf32>
    %65 = tpu.matmul %63, %64, %cst_56 {dimension_numbers = #tpu.dot_dimension_numbers<[1], [0], [0], [1], [0, 0, 1, 1], [], []>} : vector<18x128xf32>, vector<128x128xf32>, vector<18x128xf32> -> vector<18x128xf32>
    %66 = arith.addf %60, %65 : vector<18x128xf32>
    %cst_57 = arith.constant 0.000000e+00 : f32
    %67 = vector.broadcast %cst_57 : f32 to vector<18x128xf32>
    %68 = arith.maximumf %66, %67 : vector<18x128xf32>
    %cst_58 = arith.constant 0.000000e+00 : f32
    %69 = vector.broadcast %cst_58 : f32 to vector<6x128xf32>
    %c0_59 = arith.constant 0 : index
    %c0_60 = arith.constant 0 : index
    %70 = vector.load %arg8[%c0_59, %c0_60] : memref<1x128xf32, #tpu.memory_space<vmem>>, vector<1x128xf32>
    %71 = vector.broadcast %70 : vector<1x128xf32> to vector<6x128xf32>
    %72 = arith.addf %69, %71 : vector<6x128xf32>
    %73 = vector.extract_strided_slice %68 {offsets = [0, 0], sizes = [6, 128], strides = [1, 1]} : vector<18x128xf32> to vector<6x128xf32>
    %c0_61 = arith.constant 0 : index
    %c0_62 = arith.constant 0 : index
    %74 = vector.load %arg7[%c0_61, %c0_62] : memref<384x128xf32, #tpu.memory_space<vmem>>, vector<128x128xf32>
    %cst_63 = arith.constant dense<0.000000e+00> : vector<6x128xf32>
    %75 = tpu.matmul %73, %74, %cst_63 {dimension_numbers = #tpu.dot_dimension_numbers<[1], [0], [0], [1], [0, 0, 1, 1], [], []>} : vector<6x128xf32>, vector<128x128xf32>, vector<6x128xf32> -> vector<6x128xf32>
    %76 = arith.addf %72, %75 : vector<6x128xf32>
    %77 = vector.extract_strided_slice %68 {offsets = [6, 0], sizes = [6, 128], strides = [1, 1]} : vector<18x128xf32> to vector<6x128xf32>
    %c128_64 = arith.constant 128 : index
    %c0_65 = arith.constant 0 : index
    %78 = vector.load %arg7[%c128_64, %c0_65] : memref<384x128xf32, #tpu.memory_space<vmem>>, vector<128x128xf32>
    %cst_66 = arith.constant dense<0.000000e+00> : vector<6x128xf32>
    %79 = tpu.matmul %77, %78, %cst_66 {dimension_numbers = #tpu.dot_dimension_numbers<[1], [0], [0], [1], [0, 0, 1, 1], [], []>} : vector<6x128xf32>, vector<128x128xf32>, vector<6x128xf32> -> vector<6x128xf32>
    %80 = arith.addf %76, %79 : vector<6x128xf32>
    %81 = vector.extract_strided_slice %68 {offsets = [12, 0], sizes = [6, 128], strides = [1, 1]} : vector<18x128xf32> to vector<6x128xf32>
    %c256_67 = arith.constant 256 : index
    %c0_68 = arith.constant 0 : index
    %82 = vector.load %arg7[%c256_67, %c0_68] : memref<384x128xf32, #tpu.memory_space<vmem>>, vector<128x128xf32>
    %cst_69 = arith.constant dense<0.000000e+00> : vector<6x128xf32>
    %83 = tpu.matmul %81, %82, %cst_69 {dimension_numbers = #tpu.dot_dimension_numbers<[1], [0], [0], [1], [0, 0, 1, 1], [], []>} : vector<6x128xf32>, vector<128x128xf32>, vector<6x128xf32> -> vector<6x128xf32>
    %84 = arith.addf %80, %83 : vector<6x128xf32>
    %cst_70 = arith.constant 11.3137083 : f32
    %85 = vector.broadcast %cst_70 : f32 to vector<6x128xf32>
    %86 = arith.mulf %84, %85 : vector<6x128xf32>
    %c0_71 = arith.constant 0 : index
    %c0_72 = arith.constant 0 : index
    %87 = vector.load %arg9[%c0_71, %c0_72] : memref<6x128xf32, #tpu.memory_space<vmem>>, vector<6x128xf32>
    %88 = arith.addf %86, %87 : vector<6x128xf32>
    %c0_73 = arith.constant 0 : index
    %c0_74 = arith.constant 0 : index
    %c0_75 = arith.constant 0 : index
    %89 = vector.load %arg10[%c0_73, %c0_74, %c0_75] : memref<1x6x128xf32, #tpu.memory_space<vmem>>, vector<1x6x128xf32>
    %90 = vector.shape_cast %89 : vector<1x6x128xf32> to vector<6x128xf32>
    %91 = vector.shape_cast %88 : vector<6x128xf32> to vector<1x6x128xf32>
    tpu.vector_store %arg10[%c0_73, %c0_74, %c0_75], %91 {strides = array<i32>} : memref<1x6x128xf32, #tpu.memory_space<vmem>>, vector<1x6x128xf32>,
    return
  }
  func.func @transform_0(%arg0: i32) -> (i32, i32, i32) {
    %c0_i32 = arith.constant 0 : i32
    %c0_i32_0 = arith.constant 0 : i32
    %c0_i32_1 = arith.constant 0 : i32
    return %arg0, %c0_i32, %c0_i32_0 : i32, i32, i32
  }
  func.func @transform_1(%arg0: i32) -> (i32, i32) {
    %c0_i32 = arith.constant 0 : i32
    %c0_i32_0 = arith.constant 0 : i32
    %c0_i32_1 = arith.constant 0 : i32
    return %c0_i32, %c0_i32_0 : i32, i32
  }
  func.func @transform_2(%arg0: i32) -> (i32, i32) {
    %c0_i32 = arith.constant 0 : i32
    %c0_i32_0 = arith.constant 0 : i32
    %c0_i32_1 = arith.constant 0 : i32
    return %c0_i32, %c0_i32_0 : i32, i32
  }
  func.func @transform_3(%arg0: i32) -> (i32, i32, i32) {
    %c0_i32 = arith.constant 0 : i32
    %c0_i32_0 = arith.constant 0 : i32
    %c0_i32_1 = arith.constant 0 : i32
    %c0_i32_2 = arith.constant 0 : i32
    return %c0_i32, %c0_i32_0, %c0_i32_1 : i32, i32, i32
  }
  func.func @transform_4(%arg0: i32) -> (i32, i32) {
    %c0_i32 = arith.constant 0 : i32
    %c0_i32_0 = arith.constant 0 : i32
    %c0_i32_1 = arith.constant 0 : i32
    return %c0_i32, %c0_i32_0 : i32, i32
  }
  func.func @transform_5(%arg0: i32) -> (i32, i32) {
    %c0_i32 = arith.constant 0 : i32
    %c0_i32_0 = arith.constant 0 : i32
    %c0_i32_1 = arith.constant 0 : i32
    return %c0_i32, %c0_i32_0 : i32, i32
  }
  func.func @transform_6(%arg0: i32) -> (i32, i32) {
    %c0_i32 = arith.constant 0 : i32
    %c0_i32_0 = arith.constant 0 : i32
    %c0_i32_1 = arith.constant 0 : i32
    return %c0_i32, %c0_i32_0 : i32, i32
  }
  func.func @transform_7(%arg0: i32) -> (i32, i32) {
    %c0_i32 = arith.constant 0 : i32
    %c0_i32_0 = arith.constant 0 : i32
    %c0_i32_1 = arith.constant 0 : i32
    return %c0_i32, %c0_i32_0 : i32, i32
  }
  func.func @transform_8(%arg0: i32) -> (i32, i32) {
    %c0_i32 = arith.constant 0 : i32
    %c0_i32_0 = arith.constant 0 : i32
    %c0_i32_1 = arith.constant 0 : i32
    return %c0_i32, %c0_i32_0 : i32, i32
  }
  func.func @transform_9(%arg0: i32) -> (i32, i32, i32) {
    %c0_i32 = arith.constant 0 : i32
    %c0_i32_0 = arith.constant 0 : i32
    %c0_i32_1 = arith.constant 0 : i32
    return %arg0, %c0_i32, %c0_i32_0 : i32, i32, i32
  }
}

</mosaic_0001>

<bundles_post_ra>
// kernel: tpu_custom_call.1
= control target key start
LH: loop header
LB: loop body
LE: loop exit
PB: predicated region body
PF: predicated region fallthrough
CT: control target
= control target key end

     0   :  { %14 = vsyncpa [#allocation3], 0  ;;  %s5068_s0 = inlined_call_operand.vmem [shape: f32[2,98,9], index: 0, kind: input, shape index: {}]   ;;  %s5069_s1 = inlined_call_operand.hbm [shape: f32[9,128], index: 1, kind: input, shape index: {}]   ;;  %s5070_s2 = inlined_call_operand.vmem [shape: f32[1,128], index: 2, kind: input, shape index: {}]   ;;  %s5071_s3 = inlined_call_operand.vmem [shape: f32[9,18,98], index: 3, kind: input, shape index: {}]   ;;  %s5072_s4 = inlined_call_operand.hbm [shape: f32[1152,128], index: 4, kind: input, shape index: {}]   ;;  %s5073_s5 = inlined_call_operand.vmem [shape: f32[1,128], index: 5, kind: input, shape index: {}]   ;;  %s5074_s6 = inlined_call_operand.hbm [shape: f32[384,128], index: 6, kind: input, shape index: {}]   ;;  %s5075_s7 = inlined_call_operand.vmem [shape: f32[1,128], index: 7, kind: input, shape index: {}]   ;;  %s5076_s8 = inlined_call_operand.vmem [shape: f32[6,128], index: 8, kind: input, shape index: {}]   ;;  %s5077_s9 = inlined_call_operand.vmem [shape: f32[2,6,128], index: 9, kind: output, shape index: {}]  }
   0x1   :  { %15 = vsyncpa [#allocation5], 0  ;;  %s4196_s30 = smov 0  }
   0x2 LB: > { %s4202_s10 = sadd.s32 4294967295, %s4137_s30   ;;  %p2698_p0 = scmp.ge.s32.totalorder %s4137_s30, 1  ;;  %s4137_s30 = sphi %s4196_s30, %s21_s30  }
   0x3   : > { %p246_p1 = scmp.lt.s32.totalorder %s4137_s30, 3  ;;  %p4024_p2 = scmp.eq.s32.totalorder %s4202_s10, 0 }
   0x4   : > { %s4139_s12 = smov [#allocation4]   ;;  %s4140_s14 = smov [#allocation2]  }
   0x5   : > { %p4207_p3 = pnand %p2698_p0, %p246_p1  ;;  %s277_s13 = sshll.u32 %s4139_s12, 4  ;;  %s278_s13 = int_to_ptr.vmem [resolvable:$true] %s277_s13 }
   0x6   : > { %s258_s15 = sshll.u32 %s4140_s14, 4  ;;  %s4141_s17 = smov [#allocation6]   ;;  %s259_s15 = int_to_ptr.vmem [resolvable:$true] %s258_s15 }
   0x7   : > { %p4014_p4 = pneg %p4207_p3  ;;  %s293_s18 = sshll.u32 %s4141_s17, 4  ;;  %s4219_s18 = int_to_ptr.vmem [resolvable:$true] %s293_s18 }
   0x8   : > { %s4056_s19 = scalar_lea.vmem %s278_s13, 18432  ;;  %p4064_p10 = scmp.lt.s32.totalorder %s278_s13, %s278_s13 }
   0x9   : > { %p4215_p5 = pnand %p4024_p2, %p4014_p4  ;;  %p4057_p7 = scmp.ne.s32.totalorder %s278_s13, %s4056_s19 }
   0xa   : > { %p4065_p11 = scmp.lt.s32.totalorder %s4056_s19, %s4056_s19 }
   0xb   : > { %p4047_p6 = pneg %p4215_p5 }
   0xc   : > { %p4066_p12 = por %p4065_p11, %p4064_p10 }
   0xd   : > { %p4059_p8 = pnand %p4057_p7, %p4047_p6 }
   0xf   : > { %p4060_p9 = pneg %p4059_p8 }
  0x11   : > { %p4067_p13 = pnand %p4066_p12, %p4060_p9 }
  0x13   : > { %4070 = shalt.err (!%p4067_p13)
}
  0x14   : > { %s4142_s20 = smov 128   ;;  %s4143_s21 = smov 8  }
  0x15   : > { %4020 = dma.hbm_to_vmem [thread:$0]  (!%p4215_p5), %s5072_s4, 18432, %s278_s13, [#allocation5], %s4142_s20, %s4142_s20, %s4143_s21  }
  0x16   : > { %s4082_s24 = scalar_lea.vmem %s259_s15, 256  ;;  %p4090_p7 = scmp.lt.s32.totalorder %s259_s15, %s259_s15 }
  0x17   : > { %p4083_p0 = scmp.ne.s32.totalorder %s259_s15, %s4082_s24  ;;  %p4091_p8 = scmp.lt.s32.totalorder %s4082_s24, %s4082_s24 }
  0x19   : > { %p4085_p1 = pnand %p4083_p0, %p4047_p6  ;;  %p4092_p10 = por %p4091_p8, %p4090_p7 }
  0x1b   : > { %p4086_p4 = pneg %p4085_p1 }
  0x1d   : > { %p4093_p9 = pnand %p4092_p10, %p4086_p4 }
  0x1f   : > { %4096 = shalt.err (!%p4093_p9)
}
  0x20   : > { %4017 = dma.hbm_to_vmem [thread:$0]  (!%p4215_p5), %s5069_s1, 256, %s259_s15, [#allocation3], %s4142_s20, %s4142_s20, %s4143_s21  }
  0x21   : > { %s4108_s27 = scalar_lea.vmem %s4219_s18, 6144  ;;  %p4116_p0 = scmp.lt.s32.totalorder %s4219_s18, %s4219_s18 }
  0x22   : > { %p4109_p11 = scmp.ne.s32.totalorder %s4219_s18, %s4108_s27  ;;  %p4117_p1 = scmp.lt.s32.totalorder %s4108_s27, %s4108_s27 }
  0x24   : > { %p4111_p12 = pnand %p4109_p11, %p4047_p6  ;;  %p4118_p4 = por %p4117_p1, %p4116_p0 }
  0x26   : > { %p4112_p13 = pneg %p4111_p12 }
  0x28   : > { %p4119_p7 = pnand %p4118_p4, %p4112_p13 }
  0x2a   : > { %4122 = shalt.err (!%p4119_p7)
}
  0x2b   : > { %4023 = dma.hbm_to_vmem [thread:$0]  (!%p4215_p5), %s5074_s6, 6144, %s4219_s18, [#allocation5], %s4142_s20, %s4142_s20, %s4143_s21  }
  0x2c   : > { %323 = sbr.rel (%p4207_p3) target bundleno = 1827 (0x723), region = 56 }
  0x31   : > { %4128 = dma.done.wait (%p4024_p2), [#allocation3], 256  }
  0x32   : > { %4130 = vsyncadd (%p4024_p2), [#allocation3], 4294967040 }
  0x33   : > { %4132 = dma.done.wait (%p4024_p2), [#allocation5], 24576  }
  0x34   : > { %4134 = vsyncadd (%p4024_p2), [#allocation5], 4294942720  ;;  %p366_p6 = scmp.lt.s32.totalorder %s4202_s10, 1  ;;  %v4144_v0 = vmov 0.0   ;;  %vm4145_vm0 = vmmov 0   ;;  %vm437_vm1 = vcmask 1040384  }
  0x35   : > { %3169 = vmatprep.subr.mxu0 %v4144_v0  ;;  %3173 = vmatprep.mubr.msk.f32.mxu0 %vm4145_vm0, %v4144_v0  ;;  %v389_v1 = vld [vmem:[#allocation2 + $0x8] sm:$0x1]  ;;  %v388_v2 = vld [vmem:[#allocation2] sm:$0xff]  ;;  %vm397_vm2 = vcmask 72704   ;;  %v702_v18 = vld [vmem:[#allocation4 + $0x68] sm:$0xff]  ;;  %vm605_vm3 = vcmask 1041408  }
  0x36   : > { %s5081_s10 = smov (!%p366_p6, %s4202_s10), 1  ;;  %3212 = vmatprep.subr.mxu1 %v4144_v0  ;;  %3238 = vmatprep.mubr.msk.f32.mxu1 %vm4145_vm0, %v4144_v0  ;;  %v704_v16 = vld [vmem:[#allocation4 + $0x78] sm:$0xff]  ;;  %v703_v17 = vld [vmem:[#allocation4 + $0x70] sm:$0xff]  ;;  %v701_v19 = vld [vmem:[#allocation4 + $0x60] sm:$0xff]  ;;  %vm595_vm4 = vcmask 801792   ;;  %vm2532_vm5 = vcmask 1043456  }
  0x37   : > { %s4001_s11 = smul.u32 104, %s5081_s10  ;;  %3170 = vmatpush3.msk.msra.mxu0 %vm437_vm1, %v389_v1  ;;  %v700_v20 = vld [vmem:[#allocation4 + $0x58] sm:$0xff]  ;;  %v699_v21 = vld [vmem:[#allocation4 + $0x50] sm:$0xff]  ;;  %v698_v22 = vld [vmem:[#allocation4 + $0x48] sm:$0xff]  ;;  %s2708_s18 = sshll.u32 %s5081_s10, 3 }
  0x38   : > { %3171 = vmatprep.subr.mxu0 %v4144_v0  ;;  %v697_v23 = vld [vmem:[#allocation4 + $0x40] sm:$0xff]  ;;  %v696_v24 = vld [vmem:[#allocation4 + $0x38] sm:$0xff]  ;;  %v695_v26 = vld [vmem:[#allocation4 + $0x30] sm:$0xff]  ;;  %s374_s23 = scalar_lea.vmem %s5077_s9, %s2708_s18 }
  0x39   : > { %s4276_s14 = scalar_lea.vmem %s5068_s0, %s4001_s11  ;;  %3172 = vmatpush3.msra.mxu0 %v388_v2  ;;  %v694_v28 = vld [vmem:[#allocation4 + $0x28] sm:$0xff]  ;;  %v693_v30 = vld [vmem:[#allocation4 + $0x20] sm:$0xff]  ;;  %v692_v32 = vld [vmem:[#allocation4 + $0x18] sm:$0xff] }
  0x3a   : > { %v375_v3 = vld [vmem:[%s4276_s14] sm:$0xff]  ;;  %3247 = vmatprep.subr.mxu0 %v4144_v0  ;;  %v376_v4 = vld [vmem:[%s4276_s14 + $0x8] sm:$0xff]  ;;  %v377_v5 = vld [vmem:[%s4276_s14 + $0x10] sm:$0xff] }
  0x3b   : > { %3174 = vmatmul.mubr.msk.f32.vlgmr.msra.gmra.mxu0 %vm397_vm2, %v375_v3  ;;  %v378_v6 = vld [vmem:[%s4276_s14 + $0x18] sm:$0xff]  ;;  %v379_v7 = vld [vmem:[%s4276_s14 + $0x20] sm:$0xff]  ;;  %v380_v8 = vld [vmem:[%s4276_s14 + $0x28] sm:$0xff] }
  0x3c   : > { %3176 = vmatprep.mubr.msk.f32.mxu0 %vm4145_vm0, %v4144_v0  ;;  %v381_v9 = vld [vmem:[%s4276_s14 + $0x30] sm:$0xff]  ;;  %v382_v10 = vld [vmem:[%s4276_s14 + $0x38] sm:$0xff]  ;;  %v383_v11 = vld [vmem:[%s4276_s14 + $0x40] sm:$0xff]  ;;  %3248 = vmatpush3.msra.mxu0 %v704_v16 }
  0x3d   : > { %v384_v12 = vld [vmem:[%s4276_s14 + $0x48] sm:$0xff]  ;;  %v385_v13 = vld [vmem:[%s4276_s14 + $0x50] sm:$0xff]  ;;  %v386_v14 = vld [vmem:[%s4276_s14 + $0x58] sm:$0xff]  ;;  %3249 = vmatprep.subr.mxu0 %v4144_v0 }
  0x3e   : > { %v387_v15 = vld [vmem:[%s4276_s14 + $0x60] sm:$0x3]  ;;  %3250 = vmatpush3.msra.mxu0 %v703_v17  ;;  %v690_v36 = vld [vmem:[#allocation4 + $0x8] sm:$0xff]  ;;  %v689_v38 = vld [vmem:[#allocation4] sm:$0xff] }
  0x3f   : > { %3177 = vmatmul.mubr.msk.f32.gmra.mxu0 %vm397_vm2, %v376_v4  ;;  %3251 = vmatprep.subr.mxu0 %v4144_v0  ;;  %v691_v34 = vld [vmem:[#allocation4 + $0x10] sm:$0xff] }
  0x40   : > { %3179 = vmatprep.mubr.msk.f32.mxu0 %vm4145_vm0, %v4144_v0  ;;  %3252 = vmatpush3.msra.mxu0 %v702_v18  ;;  %v2709_v56 = vld [vmem:[%s5070_s2] ss:$0 sm:$0xff] }
  0x41   : > { %3253 = vmatprep.subr.mxu0 %v4144_v0 }
  0x42   : > { %3254 = vmatpush3.msra.mxu0 %v701_v19 }
  0x43   : > { %3180 = vmatmul.mubr.msk.f32.gmra.mxu0 %vm397_vm2, %v377_v5  ;;  %3255 = vmatprep.subr.mxu0 %v4144_v0 }
  0x44   : > { %3182 = vmatprep.mubr.msk.f32.mxu0 %vm4145_vm0, %v4144_v0  ;;  %3256 = vmatpush3.msra.mxu0 %v700_v20 }
  0x45   : > { %3257 = vmatprep.subr.mxu0 %v4144_v0 }
  0x46   : > { %3258 = vmatpush3.msra.mxu0 %v699_v21 }
  0x47   : > { %3183 = vmatmul.mubr.msk.f32.gmra.mxu0 %vm397_vm2, %v378_v6  ;;  %3259 = vmatprep.subr.mxu0 %v4144_v0 }
  0x48   : > { %3185 = vmatprep.mubr.msk.f32.mxu0 %vm4145_vm0, %v4144_v0  ;;  %3260 = vmatpush3.msra.mxu0 %v698_v22  ;;  %v592_v22 = vld [vmem:[%s5071_s3] sm:$0xff] }
  0x49   : > { %3261 = vmatprep.subr.mxu0 %v4144_v0 }
  0x4a   : > { %3262 = vmatpush3.msra.mxu0 %v697_v23  ;;  %v593_v23 = vld [vmem:[%s5071_s3 + $0x8] sm:$0xff] }
  0x4b   : > { %3186 = vmatmul.mubr.msk.f32.gmra.mxu0 %vm397_vm2, %v379_v7  ;;  %3263 = vmatprep.subr.mxu0 %v4144_v0 }
  0x4c   : > { %3188 = vmatprep.mubr.msk.f32.mxu0 %vm4145_vm0, %v4144_v0  ;;  %3264 = vmatpush3.msra.mxu0 %v696_v24  ;;  %v594_v24 = vld [vmem:[%s5071_s3 + $0x10] sm:$0x3] }
  0x4d   : > { %3265 = vmatprep.subr.mxu0 %v4144_v0 }
  0x4e   : > { %3266 = vmatpush3.msra.mxu0 %v695_v26  ;;  %v896_v26 = vld [vmem:[#allocation4 + $0xf8] sm:$0xff] }
  0x4f   : > { %3189 = vmatmul.mubr.msk.f32.gmra.mxu0 %vm397_vm2, %v380_v8  ;;  %3267 = vmatprep.subr.mxu0 %v4144_v0 }
  0x50   : > { %3191 = vmatprep.mubr.msk.f32.mxu0 %vm4145_vm0, %v4144_v0  ;;  %3268 = vmatpush3.msra.mxu0 %v694_v28  ;;  %v2730_v28 = vld [vmem:[%s5071_s3 + $0x20] sm:$0xff] }
  0x51   : > { %3269 = vmatprep.subr.mxu0 %v4144_v0 }
  0x52   : > { %3270 = vmatpush3.msra.mxu0 %v693_v30  ;;  %v2731_v30 = vld [vmem:[%s5071_s3 + $0x28] sm:$0x3] }
  0x53   : > { %3192 = vmatmul.mubr.msk.f32.gmra.mxu0 %vm397_vm2, %v381_v9  ;;  %3271 = vmatprep.subr.mxu0 %v4144_v0 }
  0x54   : > { %3194 = vmatprep.mubr.msk.f32.mxu0 %vm4145_vm0, %v4144_v0  ;;  %3272 = vmatpush3.msra.mxu0 %v692_v32  ;;  %v892_v32 = vld [vmem:[#allocation4 + $0xd8] sm:$0xff] }
  0x55   : > { %3273 = vmatprep.subr.mxu0 %v4144_v0 }
  0x56   : > { %3274 = vmatpush3.msra.mxu0 %v691_v34  ;;  %v890_v34 = vld [vmem:[#allocation4 + $0xc8] sm:$0xff] }
  0x57   : > { %3195 = vmatmul.mubr.msk.f32.gmra.mxu0 %vm397_vm2, %v382_v10  ;;  %3275 = vmatprep.subr.mxu0 %v4144_v0 }
  0x58   : > { %3197 = vmatprep.mubr.msk.f32.mxu0 %vm4145_vm0, %v4144_v0  ;;  %3276 = vmatpush3.msra.mxu0 %v690_v36  ;;  %v888_v36 = vld [vmem:[#allocation4 + $0xb8] sm:$0xff] }
  0x59   : > { %3277 = vmatprep.subr.mxu0 %v4144_v0 }
  0x5a   : > { %3278 = vmatpush3.msra.mxu0 %v689_v38  ;;  %v886_v38 = vld [vmem:[#allocation4 + $0xa8] sm:$0xff] }
  0x5b   : > { %3198 = vmatmul.mubr.msk.f32.gmra.mxu0 %vm397_vm2, %v383_v11  ;;  %3364 = vmatprep.subr.mxu0 %v4144_v0 }
  0x5c   : > { %3200 = vmatprep.mubr.msk.f32.mxu0 %vm4145_vm0, %v4144_v0 }
  0x5f   : > { %3201 = vmatmul.mubr.msk.f32.gmra.mxu0 %vm397_vm2, %v384_v12 }
  0x60   : > { %3203 = vmatprep.mubr.msk.f32.mxu0 %vm4145_vm0, %v4144_v0 }
  0x63   : > { %3204 = vmatmul.mubr.msk.f32.gmra.mxu0 %vm397_vm2, %v385_v13 }
  0x64   : > { %3206 = vmatprep.mubr.msk.f32.mxu0 %vm4145_vm0, %v4144_v0 }
  0x67   : > { %3207 = vmatmul.mubr.msk.f32.gmra.mxu0 %vm397_vm2, %v386_v14 }
  0x68   : > { %3209 = vmatprep.mubr.msk.f32.mxu0 %vm4145_vm0, %v4144_v0 }
  0x6b   : > { %3210 = vmatmul.mubr.msk.f32.gmra.mxu0 %vm397_vm2, %v387_v15 }
  0x6c   : > { %3279 = vmatprep.mubr.msk.f32.mxu0 %vm4145_vm0, %v4144_v0 }
  0xfb   : > { %v4339_v25 = vpop.f32.mrf.mxu0 }
  0xfc   : > { %v508_v18 = vadd.f32 %v2709_v56, %v4339_v25  ;;  %v2729_v25 = vld [vmem:[%s5071_s3 + $0x18] sm:$0xff] }
  0xfd   : > { %v3175_v27 = vpop.f32.mrf.mxu0 }
  0xfe   : > { %v4407_v21 = vmax.f32 %v508_v18, 0.0  ;;  %v895_v27 = vld [vmem:[#allocation4 + $0xf0] sm:$0xff]  ;;  %v1280_v18 = vld [vmem:[#allocation4 + $0x1f8] sm:$0xff] }
  0xff   : > { %v4343_v29 = vpop.f32.mrf.mxu0 }
 0x100   : > { %v513_v16 = vadd.f32 %v2709_v56, %v4343_v29  ;;  %v894_v29 = vld [vmem:[#allocation4 + $0xe8] sm:$0xff] }
 0x101   : > { %v3178_v31 = vpop.f32.mrf.mxu0 }
 0x102   : > { %v4403_v20 = vmax.f32 %v513_v16, 0.0  ;;  %v893_v31 = vld [vmem:[#allocation4 + $0xe0] sm:$0xff]  ;;  %v1080_v16 = vld [vmem:[#allocation4 + $0x138] sm:$0xff] }
 0x103   : > { %v4347_v33 = vpop.f32.mrf.mxu0 }
 0x104   : > { %v518_v14 = vadd.f32 %v2709_v56, %v4347_v33  ;;  %v891_v33 = vld [vmem:[#allocation4 + $0xd0] sm:$0xff] }
 0x105   : > { %v3181_v35 = vpop.f32.mrf.mxu0 }
 0x106   : > { %v4399_v19 = vmax.f32 %v518_v14, 0.0  ;;  %v889_v35 = vld [vmem:[#allocation4 + $0xc0] sm:$0xff] }
 0x107   : > { %v522_v37 = vpop.f32.mrf.mxu0  ;;  %v1081_v14 = vld [vmem:[#allocation4 + $0x140] sm:$0xff] }
 0x108   : > { %v523_v12 = vadd.f32 %v2709_v56, %v522_v37  ;;  %v887_v37 = vld [vmem:[#allocation4 + $0xb0] sm:$0xff] }
 0x109   : > { %v3184_v39 = vpop.f32.mrf.mxu0 }
 0x10a   : > { %v4394_v17 = vmax.f32 %v523_v12, 0.0  ;;  %v885_v39 = vld [vmem:[#allocation4 + $0xa0] sm:$0xff]  ;;  %v1082_v12 = vld [vmem:[#allocation4 + $0x148] sm:$0xff] }
 0x10b   : > { %v527_v40 = vpop.f32.mrf.mxu0 }
 0x10c   : > { %v528_v10 = vadd.f32 %v2709_v56, %v527_v40  ;;  %v884_v40 = vld [vmem:[#allocation4 + $0x98] sm:$0xff] }
 0x10d   : > { %v3187_v41 = vpop.f32.mrf.mxu0 }
 0x10e   : > { %v4389_v15 = vmax.f32 %v528_v10, 0.0  ;;  %v883_v41 = vld [vmem:[#allocation4 + $0x90] sm:$0xff] }
 0x10f   : > { %v532_v42 = vpop.f32.mrf.mxu0  ;;  %v1083_v10 = vld [vmem:[#allocation4 + $0x150] sm:$0xff] }
 0x110   : > { %v533_v8 = vadd.f32 %v2709_v56, %v532_v42  ;;  %v882_v42 = vld [vmem:[#allocation4 + $0x88] sm:$0xff] }
 0x111   : > { %v3190_v43 = vpop.f32.mrf.mxu0 }
 0x112   : > { %v4384_v13 = vmax.f32 %v533_v8, 0.0  ;;  %v881_v43 = vld [vmem:[#allocation4 + $0x80] sm:$0xff]  ;;  %v1084_v8 = vld [vmem:[#allocation4 + $0x158] sm:$0xff] }
 0x113   : > { %v537_v44 = vpop.f32.mrf.mxu0 }
 0x114   : > { %v538_v6 = vadd.f32 %v2709_v56, %v537_v44 }
 0x115   : > { %v3193_v45 = vpop.f32.mrf.mxu0 }
 0x116   : > { %v4380_v11 = vmax.f32 %v538_v6, 0.0  ;;  %v1085_v6 = vld [vmem:[#allocation4 + $0x160] sm:$0xff] }
 0x117   : > { %v542_v46 = vpop.f32.mrf.mxu0 }
 0x118   : > { %v543_v4 = vadd.f32 %v2709_v56, %v542_v46 }
 0x119   : > { %v3196_v47 = vpop.f32.mrf.mxu0 }
 0x11a   : > { %v4376_v9 = vmax.f32 %v543_v4, 0.0  ;;  %v2745_v4 = vld [vmem:[%s5071_s3 + $0x58] sm:$0x3] }
 0x11b   : > { %v547_v48 = vpop.f32.mrf.mxu0 }
 0x11c   : > { %v548_v2 = vadd.f32 %v2709_v56, %v547_v48 }
 0x11d   : > { %v3199_v49 = vpop.f32.mrf.mxu0 }
 0x11e   : > { %v4372_v7 = vmax.f32 %v548_v2, 0.0  ;;  %v2744_v2 = vld [vmem:[%s5071_s3 + $0x50] sm:$0xff] }
 0x11f   : > { %v552_v50 = vpop.f32.mrf.mxu0 }
 0x120   : > { %v553_v63 = vadd.f32 %v2709_v56, %v552_v50  ;;  %v2736_v50 = vld [vmem:[%s5071_s3 + $0x30] sm:$0xff] }
 0x121   : > { %v3202_v51 = vpop.f32.mrf.mxu0 }
 0x122   : > { %v4368_v5 = vmax.f32 %v553_v63, 0.0  ;;  %v2743_v63 = vld [vmem:[%s5071_s3 + $0x48] sm:$0xff] }
 0x123   : > { %v557_v52 = vpop.f32.mrf.mxu0 }
 0x124   : > { %v558_v61 = vadd.f32 %v2709_v56, %v557_v52 }
 0x125   : > { %v3205_v53 = vpop.f32.mrf.mxu0 }
 0x126   : > { %v4364_v3 = vmax.f32 %v558_v61, 0.0  ;;  %v2737_v53 = vld [vmem:[%s5071_s3 + $0x38] sm:$0xff] }
 0x127   : > { %v562_v54 = vpop.f32.mrf.mxu0  ;;  %v1086_v61 = vld [vmem:[#allocation4 + $0x168] sm:$0xff] }
 0x128   : > { %v563_v58 = vadd.f32 %v2709_v56, %v562_v54 }
 0x129   : > { %v3208_v55 = vpop.f32.mrf.mxu0 }
 0x12a   : > { %v4359_v1 = vmax.f32 %v563_v58, 0.0  ;;  %v1088_v55 = vld [vmem:[#allocation4 + $0x178] sm:$0xff] }
 0x12b   : > { %v567_v57 = vpop.f32.mrf.mxu0 }
 0x12c   : > { %v568_v59 = vadd.f32 %v2709_v56, %v567_v57  ;;  %v2738_v57 = vld [vmem:[%s5071_s3 + $0x40] sm:$0x3] }
 0x12d   : > { %v3211_v60 = vpop.f32.mrf.mxu0 }
 0x12e   : > { %v4357_v62 = vmax.f32 %v568_v59, 0.0  ;;  %v1087_v59 = vld [vmem:[#allocation4 + $0x170] sm:$0xff] }
 0x130   : > { %3213 = vmatpush3.msk.msra.mxu1 %vm605_vm3, %v4357_v62 }
 0x131   : > { %3214 = vmatprep.subr.mxu1 %v4144_v0 }
 0x132   : > { %3215 = vmatpush3.msra.mxu1 %v4359_v1 }
 0x133   : > { %3216 = vmatprep.subr.mxu1 %v4144_v0 }
 0x134   : > { %3217 = vmatpush3.msra.mxu1 %v4364_v3 }
 0x135   : > { %3218 = vmatprep.subr.mxu1 %v4144_v0 }
 0x136   : > { %3219 = vmatpush3.msra.mxu1 %v4368_v5 }
 0x137   : > { %3220 = vmatprep.subr.mxu1 %v4144_v0 }
 0x138   : > { %3221 = vmatpush3.msra.mxu1 %v4372_v7 }
 0x139   : > { %3222 = vmatprep.subr.mxu1 %v4144_v0 }
 0x13a   : > { %3223 = vmatpush3.msra.mxu1 %v4376_v9 }
 0x13b   : > { %3224 = vmatprep.subr.mxu1 %v4144_v0 }
 0x13c   : > { %3225 = vmatpush3.msra.mxu1 %v4380_v11 }
 0x13d   : > { %3226 = vmatprep.subr.mxu1 %v4144_v0 }
 0x13e   : > { %3227 = vmatpush3.msra.mxu1 %v4384_v13 }
 0x13f   : > { %3228 = vmatprep.subr.mxu1 %v4144_v0 }
 0x140   : > { %3229 = vmatpush3.msra.mxu1 %v4389_v15 }
 0x141   : > { %3230 = vmatprep.subr.mxu1 %v4144_v0 }
 0x142   : > { %3231 = vmatpush3.msra.mxu1 %v4394_v17 }
 0x143   : > { %3232 = vmatprep.subr.mxu1 %v4144_v0 }
 0x144   : > { %3233 = vmatpush3.msra.mxu1 %v4399_v19 }
 0x145   : > { %3234 = vmatprep.subr.mxu1 %v4144_v0 }
 0x146   : > { %3235 = vmatpush3.msra.mxu1 %v4403_v20 }
 0x147   : > { %3236 = vmatprep.subr.mxu1 %v4144_v0 }
 0x148   : > { %3237 = vmatpush3.msra.mxu1 %v4407_v21 }
 0x149   : > { %3239 = vmatmul.mubr.msk.f32.vlgmr.msra.gmra.mxu1 %vm595_vm4, %v592_v22  ;;  %3288 = vmatprep.subr.mxu1 %v4144_v0  ;;  %v1279_v22 = vld [vmem:[#allocation4 + $0x1f0] sm:$0xff] }
 0x14a   : > { %3289 = vmatpush3.msk.msra.mxu1 %vm605_vm3, %v4357_v62  ;;  %3241 = vmatprep.mubr.msk.f32.mxu1 %vm4145_vm0, %v4144_v0 }
 0x14b   : > { %3290 = vmatprep.subr.mxu1 %v4144_v0 }
 0x14c   : > { %3291 = vmatpush3.msra.mxu1 %v4359_v1 }
 0x14d   : > { %3292 = vmatprep.subr.mxu1 %v4144_v0  ;;  %3242 = vmatmul.mubr.msk.f32.gmra.mxu1 %vm595_vm4, %v593_v23  ;;  %v1079_v23 = vld [vmem:[#allocation4 + $0x130] sm:$0xff] }
 0x14e   : > { %3293 = vmatpush3.msra.mxu1 %v4364_v3  ;;  %3244 = vmatprep.mubr.msk.f32.mxu1 %vm4145_vm0, %v4144_v0 }
 0x14f   : > { %3294 = vmatprep.subr.mxu1 %v4144_v0 }
 0x150   : > { %3295 = vmatpush3.msra.mxu1 %v4368_v5 }
 0x151   : > { %3296 = vmatprep.subr.mxu1 %v4144_v0  ;;  %3245 = vmatmul.mubr.msk.f32.gmra.mxu1 %vm595_vm4, %v594_v24  ;;  %v1278_v24 = vld [vmem:[#allocation4 + $0x1e8] sm:$0xff] }
 0x152   : > { %3297 = vmatpush3.msra.mxu1 %v4372_v7  ;;  %3314 = vmatprep.mubr.msk.f32.mxu1 %vm4145_vm0, %v4144_v0 }
 0x153   : > { %3298 = vmatprep.subr.mxu1 %v4144_v0 }
 0x154   : > { %3299 = vmatpush3.msra.mxu1 %v4376_v9 }
 0x155   : > { %3300 = vmatprep.subr.mxu1 %v4144_v0 }
 0x156   : > { %3301 = vmatpush3.msra.mxu1 %v4380_v11 }
 0x157   : > { %3302 = vmatprep.subr.mxu1 %v4144_v0 }
 0x158   : > { %3303 = vmatpush3.msra.mxu1 %v4384_v13 }
 0x159   : > { %3304 = vmatprep.subr.mxu1 %v4144_v0 }
 0x15a   : > { %3305 = vmatpush3.msra.mxu1 %v4389_v15 }
 0x15b   : > { %3306 = vmatprep.subr.mxu1 %v4144_v0 }
 0x15c   : > { %3307 = vmatpush3.msra.mxu1 %v4394_v17 }
 0x15d   : > { %3308 = vmatprep.subr.mxu1 %v4144_v0 }
 0x15e   : > { %3309 = vmatpush3.msra.mxu1 %v4399_v19 }
 0x15f   : > { %3310 = vmatprep.subr.mxu1 %v4144_v0 }
 0x160   : > { %3311 = vmatpush3.msra.mxu1 %v4403_v20 }
 0x161   : > { %3312 = vmatprep.subr.mxu1 %v4144_v0 }
 0x162   : > { %3313 = vmatpush3.msra.mxu1 %v4407_v21 }
 0x163   : > { %3315 = vmatmul.mubr.msk.f32.vlgmr.msra.gmra.mxu1 %vm595_vm4, %v2729_v25  ;;  %3323 = vmatprep.subr.mxu1 %v4144_v0  ;;  %v1078_v25 = vld [vmem:[#allocation4 + $0x128] sm:$0xff] }
 0x164   : > { %3317 = vmatprep.mubr.msk.f32.mxu1 %vm4145_vm0, %v4144_v0  ;;  %3324 = vmatpush3.msra.mxu1 %v896_v26  ;;  %v1077_v26 = vld [vmem:[#allocation4 + $0x120] sm:$0xff] }
 0x165   : > { %3325 = vmatprep.subr.mxu1 %v4144_v0 }
 0x166   : > { %3326 = vmatpush3.msra.mxu1 %v895_v27  ;;  %v1076_v27 = vld [vmem:[#allocation4 + $0x118] sm:$0xff] }
 0x167   : > { %3318 = vmatmul.mubr.msk.f32.gmra.mxu1 %vm595_vm4, %v2730_v28  ;;  %3327 = vmatprep.subr.mxu1 %v4144_v0  ;;  %v1075_v28 = vld [vmem:[#allocation4 + $0x110] sm:$0xff] }
 0x168   : > { %3320 = vmatprep.mubr.msk.f32.mxu1 %vm4145_vm0, %v4144_v0  ;;  %3328 = vmatpush3.msra.mxu1 %v894_v29  ;;  %v1074_v29 = vld [vmem:[#allocation4 + $0x108] sm:$0xff] }
 0x169   : > { %3329 = vmatprep.subr.mxu1 %v4144_v0 }
 0x16a   : > { %3330 = vmatpush3.msra.mxu1 %v893_v31  ;;  %v1277_v31 = vld [vmem:[#allocation4 + $0x1e0] sm:$0xff] }
 0x16b   : > { %3321 = vmatmul.mubr.msk.f32.gmra.mxu1 %vm595_vm4, %v2731_v30  ;;  %3331 = vmatprep.subr.mxu1 %v4144_v0  ;;  %v1073_v30 = vld [vmem:[#allocation4 + $0x100] sm:$0xff] }
 0x16c   : > { %3355 = vmatprep.mubr.msk.f32.mxu1 %vm4145_vm0, %v4144_v0  ;;  %3332 = vmatpush3.msra.mxu1 %v892_v32  ;;  %v1276_v32 = vld [vmem:[#allocation4 + $0x1d8] sm:$0xff] }
 0x16d   : > { %3333 = vmatprep.subr.mxu1 %v4144_v0 }
 0x16e   : > { %3334 = vmatpush3.msra.mxu1 %v891_v33  ;;  %v1275_v33 = vld [vmem:[#allocation4 + $0x1d0] sm:$0xff] }
 0x16f   : > { %3335 = vmatprep.subr.mxu1 %v4144_v0 }
 0x170   : > { %3336 = vmatpush3.msra.mxu1 %v890_v34  ;;  %v1274_v34 = vld [vmem:[#allocation4 + $0x1c8] sm:$0xff] }
 0x171   : > { %3337 = vmatprep.subr.mxu1 %v4144_v0 }
 0x172   : > { %3338 = vmatpush3.msra.mxu1 %v889_v35  ;;  %v1273_v35 = vld [vmem:[#allocation4 + $0x1c0] sm:$0xff] }
 0x173   : > { %3339 = vmatprep.subr.mxu1 %v4144_v0 }
 0x174   : > { %3340 = vmatpush3.msra.mxu1 %v888_v36  ;;  %v1272_v36 = vld [vmem:[#allocation4 + $0x1b8] sm:$0xff] }
 0x175   : > { %3341 = vmatprep.subr.mxu1 %v4144_v0 }
 0x176   : > { %3342 = vmatpush3.msra.mxu1 %v887_v37  ;;  %v1271_v37 = vld [vmem:[#allocation4 + $0x1b0] sm:$0xff] }
 0x177   : > { %3343 = vmatprep.subr.mxu1 %v4144_v0 }
 0x178   : > { %3344 = vmatpush3.msra.mxu1 %v886_v38  ;;  %v1270_v38 = vld [vmem:[#allocation4 + $0x1a8] sm:$0xff] }
 0x179   : > { %3345 = vmatprep.subr.mxu1 %v4144_v0 }
 0x17a   : > { %3346 = vmatpush3.msra.mxu1 %v885_v39  ;;  %v1269_v39 = vld [vmem:[#allocation4 + $0x1a0] sm:$0xff] }
 0x17b   : > { %3347 = vmatprep.subr.mxu1 %v4144_v0 }
 0x17c   : > { %3348 = vmatpush3.msra.mxu1 %v884_v40  ;;  %v1268_v40 = vld [vmem:[#allocation4 + $0x198] sm:$0xff] }
 0x17d   : > { %3349 = vmatprep.subr.mxu1 %v4144_v0 }
 0x17e   : > { %3350 = vmatpush3.msra.mxu1 %v883_v41  ;;  %v1267_v41 = vld [vmem:[#allocation4 + $0x190] sm:$0xff] }
 0x17f   : > { %3351 = vmatprep.subr.mxu1 %v4144_v0 }
 0x180   : > { %3352 = vmatpush3.msra.mxu1 %v882_v42  ;;  %v1266_v42 = vld [vmem:[#allocation4 + $0x188] sm:$0xff] }
 0x181   : > { %3353 = vmatprep.subr.mxu1 %v4144_v0 }
 0x182   : > { %3354 = vmatpush3.msra.mxu1 %v881_v43  ;;  %v1265_v43 = vld [vmem:[#allocation4 + $0x180] sm:$0xff] }
 0x183   : > { %3440 = vmatprep.subr.mxu1 %v4144_v0 }
 0x209   : > { %v675_v44 = vpop.f32.mrf.mxu1 }
 0x20a   : > { %3280 = vmatmul.mubr.f32.vlgmr.msra.gmra.mxu0 %v675_v44 }
 0x20b   : > { %3365 = vmatpush3.msk.msra.mxu0 %vm605_vm3, %v4357_v62  ;;  %v3240_v45 = vpop.f32.mrf.mxu1  ;;  %3282 = vmatprep.mubr.msk.f32.mxu0 %vm4145_vm0, %v4144_v0 }
 0x20c   : > { %3366 = vmatprep.subr.mxu0 %v4144_v0 }
 0x20d   : > { %3367 = vmatpush3.msra.mxu0 %v4359_v1  ;;  %v680_v46 = vpop.f32.mrf.mxu1 }
 0x20e   : > { %3368 = vmatprep.subr.mxu0 %v4144_v0  ;;  %3283 = vmatmul.mubr.f32.gmra.mxu0 %v680_v46 }
 0x20f   : > { %3369 = vmatpush3.msra.mxu0 %v4364_v3  ;;  %v3243_v47 = vpop.f32.mrf.mxu1  ;;  %3285 = vmatprep.mubr.msk.f32.mxu0 %vm4145_vm0, %v4144_v0 }
 0x210   : > { %3370 = vmatprep.subr.mxu0 %v4144_v0 }
 0x211   : > { %3371 = vmatpush3.msra.mxu0 %v4368_v5  ;;  %v685_v48 = vpop.f32.mrf.mxu1 }
 0x212   : > { %3372 = vmatprep.subr.mxu0 %v4144_v0  ;;  %3286 = vmatmul.mubr.f32.gmra.mxu0 %v685_v48 }
 0x213   : > { %3373 = vmatpush3.msra.mxu0 %v4372_v7  ;;  %v3246_v49 = vpop.f32.mrf.mxu1  ;;  %3390 = vmatprep.mubr.msk.f32.mxu0 %vm4145_vm0, %v4144_v0 }
 0x214   : > { %3374 = vmatprep.subr.mxu0 %v4144_v0 }
 0x215   : > { %3375 = vmatpush3.msra.mxu0 %v4376_v9 }
 0x216   : > { %3376 = vmatprep.subr.mxu0 %v4144_v0 }
 0x217   : > { %3377 = vmatpush3.msra.mxu0 %v4380_v11 }
 0x218   : > { %3378 = vmatprep.subr.mxu0 %v4144_v0 }
 0x219   : > { %3379 = vmatpush3.msra.mxu0 %v4384_v13 }
 0x21a   : > { %3380 = vmatprep.subr.mxu0 %v4144_v0 }
 0x21b   : > { %3381 = vmatpush3.msra.mxu0 %v4389_v15 }
 0x21c   : > { %3382 = vmatprep.subr.mxu0 %v4144_v0 }
 0x21d   : > { %3383 = vmatpush3.msra.mxu0 %v4394_v17 }
 0x21e   : > { %3384 = vmatprep.subr.mxu0 %v4144_v0 }
 0x21f   : > { %3385 = vmatpush3.msra.mxu0 %v4399_v19 }
 0x220   : > { %3386 = vmatprep.subr.mxu0 %v4144_v0 }
 0x221   : > { %3387 = vmatpush3.msra.mxu0 %v4403_v20 }
 0x222   : > { %3388 = vmatprep.subr.mxu0 %v4144_v0 }
 0x223   : > { %3389 = vmatpush3.msra.mxu0 %v4407_v21  ;;  %v867_v51 = vpop.f32.mrf.mxu1 }
 0x224   : > { %3391 = vmatmul.mubr.msk.f32.vlgmr.msra.gmra.mxu0 %vm595_vm4, %v2736_v50  ;;  %3356 = vmatmul.mubr.f32.vlgmr.msra.gmra.mxu1 %v867_v51  ;;  %v2724_v50 = vld [vmem:[%s5073_s5] ss:$0 sm:$0xff] }
 0x225   : > { %3441 = vmatpush3.msk.msra.mxu1 %vm605_vm3, %v4357_v62  ;;  %v3316_v52 = vpop.f32.mrf.mxu1  ;;  %3393 = vmatprep.mubr.msk.f32.mxu0 %vm4145_vm0, %v4144_v0 }
 0x226   : > { %3442 = vmatprep.subr.mxu1 %v4144_v0  ;;  %3358 = vmatprep.mubr.msk.f32.mxu1 %vm4145_vm0, %v4144_v0 }
 0x227   : > { %3443 = vmatpush3.msra.mxu1 %v4359_v1  ;;  %v872_v54 = vpop.f32.mrf.mxu1  ;;  %3399 = vmatprep.subr.mxu0 %v4144_v0 }
 0x228   : > { %3394 = vmatmul.mubr.msk.f32.gmra.mxu0 %vm595_vm4, %v2737_v53  ;;  %3444 = vmatprep.subr.mxu1 %v4144_v0 }
 0x229   : > { %3359 = vmatmul.mubr.f32.gmra.mxu1 %v872_v54  ;;  %v3319_v56 = vpop.f32.mrf.mxu1  ;;  %3396 = vmatprep.mubr.msk.f32.mxu0 %vm4145_vm0, %v4144_v0 }
 0x22a   : > { %3445 = vmatpush3.msra.mxu1 %v4364_v3  ;;  %3361 = vmatprep.mubr.msk.f32.mxu1 %vm4145_vm0, %v4144_v0 }
 0x22b   : > { %3446 = vmatprep.subr.mxu1 %v4144_v0  ;;  %v877_v58 = vpop.f32.mrf.mxu1  ;;  %3400 = vmatpush3.msra.mxu0 %v1088_v55 }
 0x22c   : > { %3447 = vmatpush3.msra.mxu1 %v4368_v5  ;;  %3397 = vmatmul.mubr.msk.f32.gmra.mxu0 %vm595_vm4, %v2738_v57 }
 0x22d   : > { %3448 = vmatprep.subr.mxu1 %v4144_v0  ;;  %3362 = vmatmul.mubr.f32.gmra.mxu1 %v877_v58  ;;  %v3322_v60 = vpop.f32.mrf.mxu1 }
 0x22e   : > { %3449 = vmatpush3.msra.mxu1 %v4372_v7  ;;  %3466 = vmatprep.mubr.msk.f32.mxu1 %vm4145_vm0, %v4144_v0 }
 0x22f   : > { %3450 = vmatprep.subr.mxu1 %v4144_v0  ;;  %3401 = vmatprep.subr.mxu0 %v4144_v0 }
 0x230   : > { %3451 = vmatpush3.msra.mxu1 %v4376_v9  ;;  %3402 = vmatpush3.msra.mxu0 %v1087_v59 }
 0x231   : > { %3452 = vmatprep.subr.mxu1 %v4144_v0  ;;  %3403 = vmatprep.subr.mxu0 %v4144_v0 }
 0x232   : > { %3453 = vmatpush3.msra.mxu1 %v4380_v11  ;;  %3404 = vmatpush3.msra.mxu0 %v1086_v61 }
 0x233   : > { %3454 = vmatprep.subr.mxu1 %v4144_v0  ;;  %3405 = vmatprep.subr.mxu0 %v4144_v0 }
 0x234   : > { %3455 = vmatpush3.msra.mxu1 %v4384_v13  ;;  %3431 = vmatprep.mubr.msk.f32.mxu0 %vm4145_vm0, %v4144_v0 }
 0x235   : > { %3456 = vmatprep.subr.mxu1 %v4144_v0  ;;  %3406 = vmatpush3.msra.mxu0 %v1085_v6 }
 0x236   : > { %3457 = vmatpush3.msra.mxu1 %v4389_v15  ;;  %3407 = vmatprep.subr.mxu0 %v4144_v0 }
 0x237   : > { %3458 = vmatprep.subr.mxu1 %v4144_v0  ;;  %3408 = vmatpush3.msra.mxu0 %v1084_v8 }
 0x238   : > { %3459 = vmatpush3.msra.mxu1 %v4394_v17  ;;  %3409 = vmatprep.subr.mxu0 %v4144_v0 }
 0x239   : > { %3460 = vmatprep.subr.mxu1 %v4144_v0  ;;  %3410 = vmatpush3.msra.mxu0 %v1083_v10 }
 0x23a   : > { %3461 = vmatpush3.msra.mxu1 %v4399_v19  ;;  %3411 = vmatprep.subr.mxu0 %v4144_v0 }
 0x23b   : > { %3462 = vmatprep.subr.mxu1 %v4144_v0  ;;  %3412 = vmatpush3.msra.mxu0 %v1082_v12 }
 0x23c   : > { %3463 = vmatpush3.msra.mxu1 %v4403_v20  ;;  %3413 = vmatprep.subr.mxu0 %v4144_v0 }
 0x23d   : > { %3464 = vmatprep.subr.mxu1 %v4144_v0  ;;  %3414 = vmatpush3.msra.mxu0 %v1081_v14  ;;  %v2750_v14 = vld [vmem:[%s5071_s3 + $0x60] sm:$0xff] }
 0x23e   : > { %3465 = vmatpush3.msra.mxu1 %v4407_v21  ;;  %3415 = vmatprep.subr.mxu0 %v4144_v0 }
 0x23f   : > { %3467 = vmatmul.mubr.msk.f32.vlgmr.msra.gmra.mxu1 %vm595_vm4, %v2743_v63  ;;  %3475 = vmatprep.subr.mxu1 %v4144_v0 }
 0x240   : > { %3469 = vmatprep.mubr.msk.f32.mxu1 %vm4145_vm0, %v4144_v0  ;;  %3476 = vmatpush3.msra.mxu1 %v1280_v18  ;;  %v1472_v18 = vld [vmem:[#allocation4 + $0x278] sm:$0xff] }
 0x241   : > { %3477 = vmatprep.subr.mxu1 %v4144_v0  ;;  %3416 = vmatpush3.msra.mxu0 %v1080_v16 }
 0x242   : > { %3478 = vmatpush3.msra.mxu1 %v1279_v22  ;;  %3417 = vmatprep.subr.mxu0 %v4144_v0  ;;  %v2751_v22 = vld [vmem:[%s5071_s3 + $0x68] sm:$0xff] }
 0x243   : > { %3470 = vmatmul.mubr.msk.f32.gmra.mxu1 %vm595_vm4, %v2744_v2  ;;  %3479 = vmatprep.subr.mxu1 %v4144_v0 }
 0x244   : > { %3472 = vmatprep.mubr.msk.f32.mxu1 %vm4145_vm0, %v4144_v0  ;;  %3418 = vmatpush3.msra.mxu0 %v1079_v23 }
 0x245   : > { %3480 = vmatpush3.msra.mxu1 %v1278_v24  ;;  %3419 = vmatprep.subr.mxu0 %v4144_v0 }
 0x246   : > { %3481 = vmatprep.subr.mxu1 %v4144_v0  ;;  %3420 = vmatpush3.msra.mxu0 %v1078_v25  ;;  %v2752_v25 = vld [vmem:[%s5071_s3 + $0x70] sm:$0x3] }
 0x247   : > { %3473 = vmatmul.mubr.msk.f32.gmra.mxu1 %vm595_vm4, %v2745_v4  ;;  %3421 = vmatprep.subr.mxu0 %v4144_v0 }
 0x248   : > { %3507 = vmatprep.mubr.msk.f32.mxu1 %vm4145_vm0, %v4144_v0  ;;  %3422 = vmatpush3.msra.mxu0 %v1077_v26 }
 0x249   : > { %3423 = vmatprep.subr.mxu0 %v4144_v0  ;;  %3482 = vmatpush3.msra.mxu1 %v1277_v31  ;;  %v2757_v31 = vld [vmem:[%s5071_s3 + $0x78] sm:$0xff] }
 0x24a   : > { %3424 = vmatpush3.msra.mxu0 %v1076_v27  ;;  %3483 = vmatprep.subr.mxu1 %v4144_v0 }
 0x24b   : > { %3425 = vmatprep.subr.mxu0 %v4144_v0  ;;  %3484 = vmatpush3.msra.mxu1 %v1276_v32  ;;  %v2758_v32 = vld [vmem:[%s5071_s3 + $0x80] sm:$0xff] }
 0x24c   : > { %3426 = vmatpush3.msra.mxu0 %v1075_v28  ;;  %3485 = vmatprep.subr.mxu1 %v4144_v0  ;;  %v1471_v28 = vld [vmem:[#allocation4 + $0x270] sm:$0xff] }
 0x24d   : > { %3427 = vmatprep.subr.mxu0 %v4144_v0  ;;  %3486 = vmatpush3.msra.mxu1 %v1275_v33  ;;  %v2759_v33 = vld [vmem:[%s5071_s3 + $0x88] sm:$0x3] }
 0x24e   : > { %3428 = vmatpush3.msra.mxu0 %v1074_v29  ;;  %3487 = vmatprep.subr.mxu1 %v4144_v0 }
 0x24f   : > { %3429 = vmatprep.subr.mxu0 %v4144_v0  ;;  %3488 = vmatpush3.msra.mxu1 %v1274_v34  ;;  %v1469_v34 = vld [vmem:[#allocation4 + $0x260] sm:$0xff] }
 0x250   : > { %3430 = vmatpush3.msra.mxu0 %v1073_v30  ;;  %3489 = vmatprep.subr.mxu1 %v4144_v0  ;;  %v1470_v30 = vld [vmem:[#allocation4 + $0x268] sm:$0xff] }
 0x251   : > { %3516 = vmatprep.subr.mxu0 %v4144_v0  ;;  %3490 = vmatpush3.msra.mxu1 %v1273_v35  ;;  %v1468_v35 = vld [vmem:[#allocation4 + $0x258] sm:$0xff] }
 0x252   : > { %3491 = vmatprep.subr.mxu1 %v4144_v0 }
 0x253   : > { %3492 = vmatpush3.msra.mxu1 %v1272_v36  ;;  %v1467_v36 = vld [vmem:[#allocation4 + $0x250] sm:$0xff] }
 0x254   : > { %3493 = vmatprep.subr.mxu1 %v4144_v0 }
 0x255   : > { %3494 = vmatpush3.msra.mxu1 %v1271_v37  ;;  %v1466_v37 = vld [vmem:[#allocation4 + $0x248] sm:$0xff] }
 0x256   : > { %3495 = vmatprep.subr.mxu1 %v4144_v0 }
 0x257   : > { %3496 = vmatpush3.msra.mxu1 %v1270_v38  ;;  %v1465_v38 = vld [vmem:[#allocation4 + $0x240] sm:$0xff] }
 0x258   : > { %3497 = vmatprep.subr.mxu1 %v4144_v0 }
 0x259   : > { %3498 = vmatpush3.msra.mxu1 %v1269_v39  ;;  %v1464_v39 = vld [vmem:[#allocation4 + $0x238] sm:$0xff] }
 0x25a   : > { %3499 = vmatprep.subr.mxu1 %v4144_v0 }
 0x25b   : > { %3500 = vmatpush3.msra.mxu1 %v1268_v40  ;;  %v1463_v40 = vld [vmem:[#allocation4 + $0x230] sm:$0xff] }
 0x25c   : > { %3501 = vmatprep.subr.mxu1 %v4144_v0 }
 0x25d   : > { %3502 = vmatpush3.msra.mxu1 %v1267_v41  ;;  %v1664_v41 = vld [vmem:[#allocation4 + $0x2f8] sm:$0xff] }
 0x25e   : > { %3503 = vmatprep.subr.mxu1 %v4144_v0 }
 0x25f   : > { %3504 = vmatpush3.msra.mxu1 %v1266_v42  ;;  %v1663_v42 = vld [vmem:[#allocation4 + $0x2f0] sm:$0xff] }
 0x260   : > { %3505 = vmatprep.subr.mxu1 %v4144_v0 }
 0x261   : > { %3506 = vmatpush3.msra.mxu1 %v1265_v43  ;;  %v1462_v43 = vld [vmem:[#allocation4 + $0x228] sm:$0xff] }
 0x262   : > { %3592 = vmatprep.subr.mxu1 %v4144_v0 }
 0x2ca   : > { %v771_v44 = vpop.f32.mrf.mxu0 }
 0x2cb   : > { %v785_v51 = vadd.f32 %v2724_v50, %v771_v44  ;;  %v1662_v44 = vld [vmem:[#allocation4 + $0x2e8] sm:$0xff] }
 0x2cc   : > { %v3281_v45 = vpop.f32.mrf.mxu0 }
 0x2cd   : > { %v1461_v45 = vld [vmem:[#allocation4 + $0x220] sm:$0xff] }
 0x2ce   : > { %v776_v46 = vpop.f32.mrf.mxu0 }
 0x2cf   : > { %v786_v57 = vadd.f32 %v2724_v50, %v776_v46  ;;  %v1460_v46 = vld [vmem:[#allocation4 + $0x218] sm:$0xff] }
 0x2d0   : > { %v3284_v47 = vpop.f32.mrf.mxu0 }
 0x2d1   : > { %v1459_v47 = vld [vmem:[#allocation4 + $0x210] sm:$0xff] }
 0x2d2   : > { %v781_v48 = vpop.f32.mrf.mxu0 }
 0x2d3   : > { %v787_v2 = vadd.f32 %v2724_v50, %v781_v48  ;;  %v1458_v48 = vld [vmem:[#allocation4 + $0x208] sm:$0xff]  ;;  %v1661_v50 = vld [vmem:[#allocation4 + $0x2e0] sm:$0xff] }
 0x2d4   : > { %v3287_v49 = vpop.f32.mrf.mxu0 }
 0x2d5   : > { %v1457_v49 = vld [vmem:[#allocation4 + $0x200] sm:$0xff] }
 0x2e4   : > { %v1059_v52 = vpop.f32.mrf.mxu0  ;;  %v963_v53 = vpop.f32.mrf.mxu1 }
 0x2e5   : > { %v4629_v54 = vadd.f32 %v963_v53, %v785_v51  ;;  %3432 = vmatmul.mubr.f32.vlgmr.msra.gmra.mxu0 %v1059_v52  ;;  %v1660_v51 = vld [vmem:[#allocation4 + $0x2d8] sm:$0xff]  ;;  %v1659_v52 = vld [vmem:[#allocation4 + $0x2d0] sm:$0xff]  ;;  %v1658_v53 = vld [vmem:[#allocation4 + $0x2c8] sm:$0xff] }
 0x2e6   : > { %3517 = vmatpush3.msk.msra.mxu0 %vm605_vm3, %v4357_v62  ;;  %v3392_v55 = vpop.f32.mrf.mxu0  ;;  %v3357_v56 = vpop.f32.mrf.mxu1  ;;  %3434 = vmatprep.mubr.msk.f32.mxu0 %vm4145_vm0, %v4144_v0 }
 0x2e7   : > { %3518 = vmatprep.subr.mxu0 %v4144_v0  ;;  %v1657_v55 = vld [vmem:[#allocation4 + $0x2c0] sm:$0xff]  ;;  %v1656_v56 = vld [vmem:[#allocation4 + $0x2b8] sm:$0xff] }
 0x2e8   : > { %3519 = vmatpush3.msra.mxu0 %v4359_v1  ;;  %v1064_v58 = vpop.f32.mrf.mxu0 }
 0x2e9   : > { %3520 = vmatprep.subr.mxu0 %v4144_v0  ;;  %v968_v59 = vpop.f32.mrf.mxu1  ;;  %3435 = vmatmul.mubr.f32.gmra.mxu0 %v1064_v58  ;;  %v1654_v58 = vld [vmem:[#allocation4 + $0x2a8] sm:$0xff] }
 0x2ea   : > { %v4638_v60 = vadd.f32 %v968_v59, %v786_v57  ;;  %3521 = vmatpush3.msra.mxu0 %v4364_v3  ;;  %v3395_v61 = vpop.f32.mrf.mxu0  ;;  %3437 = vmatprep.mubr.msk.f32.mxu0 %vm4145_vm0, %v4144_v0  ;;  %v1655_v57 = vld [vmem:[#allocation4 + $0x2b0] sm:$0xff]  ;;  %v1653_v59 = vld [vmem:[#allocation4 + $0x2a0] sm:$0xff] }
 0x2eb   : > { %3522 = vmatprep.subr.mxu0 %v4144_v0  ;;  %v3360_v63 = vpop.f32.mrf.mxu1  ;;  %v1652_v61 = vld [vmem:[#allocation4 + $0x298] sm:$0xff] }
 0x2ec   : > { %3523 = vmatpush3.msra.mxu0 %v4368_v5  ;;  %v1069_v4 = vpop.f32.mrf.mxu0  ;;  %v1651_v63 = vld [vmem:[#allocation4 + $0x290] sm:$0xff] }
 0x2ed   : > { %3524 = vmatprep.subr.mxu0 %v4144_v0  ;;  %v973_v6 = vpop.f32.mrf.mxu1  ;;  %3438 = vmatmul.mubr.f32.gmra.mxu0 %v1069_v4  ;;  %v1649_v4 = vld [vmem:[#allocation4 + $0x280] sm:$0xff] }
 0x2ee   : > { %v4646_v8 = vadd.f32 %v973_v6, %v787_v2  ;;  %3525 = vmatpush3.msra.mxu0 %v4372_v7  ;;  %v3398_v10 = vpop.f32.mrf.mxu0  ;;  %3542 = vmatprep.mubr.msk.f32.mxu0 %vm4145_vm0, %v4144_v0  ;;  %v1650_v2 = vld [vmem:[#allocation4 + $0x288] sm:$0xff] }
 0x2ef   : > { %3526 = vmatprep.subr.mxu0 %v4144_v0  ;;  %v3363_v12 = vpop.f32.mrf.mxu1 }
 0x2f0   : > { %3527 = vmatpush3.msra.mxu0 %v4376_v9 }
 0x2f1   : > { %3528 = vmatprep.subr.mxu0 %v4144_v0 }
 0x2f2   : > { %3529 = vmatpush3.msra.mxu0 %v4380_v11 }
 0x2f3   : > { %3530 = vmatprep.subr.mxu0 %v4144_v0 }
 0x2f4   : > { %3531 = vmatpush3.msra.mxu0 %v4384_v13 }
 0x2f5   : > { %3532 = vmatprep.subr.mxu0 %v4144_v0 }
 0x2f6   : > { %3533 = vmatpush3.msra.mxu0 %v4389_v15 }
 0x2f7   : > { %3534 = vmatprep.subr.mxu0 %v4144_v0 }
 0x2f8   : > { %3535 = vmatpush3.msra.mxu0 %v4394_v17 }
 0x2f9   : > { %3536 = vmatprep.subr.mxu0 %v4144_v0 }
 0x2fa   : > { %3537 = vmatpush3.msra.mxu0 %v4399_v19 }
 0x2fb   : > { %3538 = vmatprep.subr.mxu0 %v4144_v0 }
 0x2fc   : > { %3539 = vmatpush3.msra.mxu0 %v4403_v20 }
 0x2fd   : > { %3540 = vmatprep.subr.mxu0 %v4144_v0 }
 0x2fe   : > { %3541 = vmatpush3.msra.mxu0 %v4407_v21 }
 0x2ff   : > { %v1251_v16 = vpop.f32.mrf.mxu1  ;;  %3543 = vmatmul.mubr.msk.f32.vlgmr.msra.gmra.mxu0 %vm595_vm4, %v2750_v14  ;;  %3551 = vmatprep.subr.mxu0 %v4144_v0 }
 0x300   : > { %3508 = vmatmul.mubr.f32.vlgmr.msra.gmra.mxu1 %v1251_v16  ;;  %3545 = vmatprep.mubr.msk.f32.mxu0 %vm4145_vm0, %v4144_v0 }
 0x301   : > { %3593 = vmatpush3.msk.msra.mxu1 %vm605_vm3, %v4357_v62  ;;  %v3468_v23 = vpop.f32.mrf.mxu1  ;;  %3510 = vmatprep.mubr.msk.f32.mxu1 %vm4145_vm0, %v4144_v0 }
 0x302   : > { %3594 = vmatprep.subr.mxu1 %v4144_v0  ;;  %3552 = vmatpush3.msra.mxu0 %v1472_v18 }
 0x303   : > { %3595 = vmatpush3.msra.mxu1 %v4359_v1  ;;  %v1256_v24 = vpop.f32.mrf.mxu1  ;;  %3546 = vmatmul.mubr.msk.f32.gmra.mxu0 %vm595_vm4, %v2751_v22 }
 0x304   : > { %3596 = vmatprep.subr.mxu1 %v4144_v0  ;;  %3511 = vmatmul.mubr.f32.gmra.mxu1 %v1256_v24 }
 0x305   : > { %3597 = vmatpush3.msra.mxu1 %v4364_v3  ;;  %v3471_v26 = vpop.f32.mrf.mxu1  ;;  %3548 = vmatprep.mubr.msk.f32.mxu0 %vm4145_vm0, %v4144_v0 }
 0x306   : > { %3598 = vmatprep.subr.mxu1 %v4144_v0  ;;  %3513 = vmatprep.mubr.msk.f32.mxu1 %vm4145_vm0, %v4144_v0 }
 0x307   : > { %3599 = vmatpush3.msra.mxu1 %v4368_v5  ;;  %v1261_v27 = vpop.f32.mrf.mxu1  ;;  %3549 = vmatmul.mubr.msk.f32.gmra.mxu0 %vm595_vm4, %v2752_v25 }
 0x308   : > { %3600 = vmatprep.subr.mxu1 %v4144_v0  ;;  %3514 = vmatmul.mubr.f32.gmra.mxu1 %v1261_v27 }
 0x309   : > { %3601 = vmatpush3.msra.mxu1 %v4372_v7  ;;  %3618 = vmatprep.mubr.msk.f32.mxu1 %vm4145_vm0, %v4144_v0  ;;  %v3474_v29 = vpop.f32.mrf.mxu1 }
 0x30a   : > { %3602 = vmatprep.subr.mxu1 %v4144_v0  ;;  %3553 = vmatprep.subr.mxu0 %v4144_v0 }
 0x30b   : > { %3603 = vmatpush3.msra.mxu1 %v4376_v9  ;;  %3554 = vmatpush3.msra.mxu0 %v1471_v28 }
 0x30c   : > { %3604 = vmatprep.subr.mxu1 %v4144_v0  ;;  %3555 = vmatprep.subr.mxu0 %v4144_v0 }
 0x30d   : > { %3605 = vmatpush3.msra.mxu1 %v4380_v11  ;;  %3556 = vmatpush3.msra.mxu0 %v1470_v30 }
 0x30e   : > { %3606 = vmatprep.subr.mxu1 %v4144_v0  ;;  %3557 = vmatprep.subr.mxu0 %v4144_v0 }
 0x30f   : > { %3607 = vmatpush3.msra.mxu1 %v4384_v13  ;;  %3583 = vmatprep.mubr.msk.f32.mxu0 %vm4145_vm0, %v4144_v0 }
 0x310   : > { %3608 = vmatprep.subr.mxu1 %v4144_v0  ;;  %3558 = vmatpush3.msra.mxu0 %v1469_v34 }
 0x311   : > { %3609 = vmatpush3.msra.mxu1 %v4389_v15  ;;  %3559 = vmatprep.subr.mxu0 %v4144_v0 }
 0x312   : > { %3610 = vmatprep.subr.mxu1 %v4144_v0  ;;  %3560 = vmatpush3.msra.mxu0 %v1468_v35 }
 0x313   : > { %3611 = vmatpush3.msra.mxu1 %v4394_v17  ;;  %3561 = vmatprep.subr.mxu0 %v4144_v0 }
 0x314   : > { %3612 = vmatprep.subr.mxu1 %v4144_v0  ;;  %3562 = vmatpush3.msra.mxu0 %v1467_v36 }
 0x315   : > { %3613 = vmatpush3.msra.mxu1 %v4399_v19  ;;  %3563 = vmatprep.subr.mxu0 %v4144_v0 }
 0x316   : > { %3614 = vmatprep.subr.mxu1 %v4144_v0  ;;  %3564 = vmatpush3.msra.mxu0 %v1466_v37  ;;  %v2764_v37 = vld [vmem:[%s5071_s3 + $0x90] sm:$0xff] }
 0x317   : > { %3615 = vmatpush3.msra.mxu1 %v4403_v20  ;;  %3565 = vmatprep.subr.mxu0 %v4144_v0 }
 0x318   : > { %3616 = vmatprep.subr.mxu1 %v4144_v0  ;;  %3566 = vmatpush3.msra.mxu0 %v1465_v38 }
 0x319   : > { %3617 = vmatpush3.msra.mxu1 %v4407_v21  ;;  %3567 = vmatprep.subr.mxu0 %v4144_v0 }
 0x31a   : > { %3619 = vmatmul.mubr.msk.f32.vlgmr.msra.gmra.mxu1 %vm595_vm4, %v2757_v31  ;;  %3627 = vmatprep.subr.mxu1 %v4144_v0 }
 0x31b   : > { %3621 = vmatprep.mubr.msk.f32.mxu1 %vm4145_vm0, %v4144_v0  ;;  %3568 = vmatpush3.msra.mxu0 %v1464_v39  ;;  %v1856_v39 = vld [vmem:[#allocation4 + $0x378] sm:$0xff] }
 0x31c   : > { %3628 = vmatpush3.msra.mxu1 %v1664_v41  ;;  %3569 = vmatprep.subr.mxu0 %v4144_v0 }
 0x31d   : > { %3629 = vmatprep.subr.mxu1 %v4144_v0  ;;  %3570 = vmatpush3.msra.mxu0 %v1463_v40  ;;  %v2765_v40 = vld [vmem:[%s5071_s3 + $0x98] sm:$0xff] }
 0x31e   : > { %3622 = vmatmul.mubr.msk.f32.gmra.mxu1 %vm595_vm4, %v2758_v32  ;;  %3571 = vmatprep.subr.mxu0 %v4144_v0 }
 0x31f   : > { %3624 = vmatprep.mubr.msk.f32.mxu1 %vm4145_vm0, %v4144_v0  ;;  %3630 = vmatpush3.msra.mxu1 %v1663_v42 }
 0x320   : > { %3631 = vmatprep.subr.mxu1 %v4144_v0  ;;  %3572 = vmatpush3.msra.mxu0 %v1462_v43  ;;  %v2766_v43 = vld [vmem:[%s5071_s3 + $0xa0] sm:$0x3] }
 0x321   : > { %3632 = vmatpush3.msra.mxu1 %v1662_v44  ;;  %3573 = vmatprep.subr.mxu0 %v4144_v0 }
 0x322   : > { %3625 = vmatmul.mubr.msk.f32.gmra.mxu1 %vm595_vm4, %v2759_v33  ;;  %3633 = vmatprep.subr.mxu1 %v4144_v0 }
 0x323   : > { %3659 = vmatprep.mubr.msk.f32.mxu1 %vm4145_vm0, %v4144_v0  ;;  %3574 = vmatpush3.msra.mxu0 %v1461_v45 }
 0x324   : > { %3575 = vmatprep.subr.mxu0 %v4144_v0  ;;  %3634 = vmatpush3.msra.mxu1 %v1661_v50  ;;  %v2772_v50 = vld [vmem:[%s5071_s3 + $0xb0] sm:$0xff] }
 0x325   : > { %3576 = vmatpush3.msra.mxu0 %v1460_v46  ;;  %3635 = vmatprep.subr.mxu1 %v4144_v0  ;;  %v1855_v46 = vld [vmem:[#allocation4 + $0x370] sm:$0xff] }
 0x326   : > { %3577 = vmatprep.subr.mxu0 %v4144_v0  ;;  %3636 = vmatpush3.msra.mxu1 %v1660_v51  ;;  %v2773_v51 = vld [vmem:[%s5071_s3 + $0xb8] sm:$0x3] }
 0x327   : > { %3578 = vmatpush3.msra.mxu0 %v1459_v47  ;;  %3637 = vmatprep.subr.mxu1 %v4144_v0 }
 0x328   : > { %3579 = vmatprep.subr.mxu0 %v4144_v0  ;;  %3638 = vmatpush3.msra.mxu1 %v1659_v52  ;;  %v1853_v52 = vld [vmem:[#allocation4 + $0x360] sm:$0xff] }
 0x329   : > { %3580 = vmatpush3.msra.mxu0 %v1458_v48  ;;  %3639 = vmatprep.subr.mxu1 %v4144_v0  ;;  %v1854_v48 = vld [vmem:[#allocation4 + $0x368] sm:$0xff] }
 0x32a   : > { %3581 = vmatprep.subr.mxu0 %v4144_v0  ;;  %3640 = vmatpush3.msra.mxu1 %v1658_v53  ;;  %v1852_v53 = vld [vmem:[#allocation4 + $0x358] sm:$0xff] }
 0x32b   : > { %3582 = vmatpush3.msra.mxu0 %v1457_v49  ;;  %3641 = vmatprep.subr.mxu1 %v4144_v0  ;;  %v2771_v49 = vld [vmem:[%s5071_s3 + $0xa8] sm:$0xff] }
 0x32c   : > { %3668 = vmatprep.subr.mxu0 %v4144_v0  ;;  %3642 = vmatpush3.msra.mxu1 %v1657_v55  ;;  %v1851_v55 = vld [vmem:[#allocation4 + $0x350] sm:$0xff] }
 0x32d   : > { %3643 = vmatprep.subr.mxu1 %v4144_v0 }
 0x32e   : > { %3644 = vmatpush3.msra.mxu1 %v1656_v56  ;;  %v1850_v56 = vld [vmem:[#allocation4 + $0x348] sm:$0xff] }
 0x32f   : > { %3645 = vmatprep.subr.mxu1 %v4144_v0 }
 0x330   : > { %3646 = vmatpush3.msra.mxu1 %v1655_v57  ;;  %v1849_v57 = vld [vmem:[#allocation4 + $0x340] sm:$0xff] }
 0x331   : > { %3647 = vmatprep.subr.mxu1 %v4144_v0 }
 0x332   : > { %3648 = vmatpush3.msra.mxu1 %v1654_v58  ;;  %v1848_v58 = vld [vmem:[#allocation4 + $0x338] sm:$0xff] }
 0x333   : > { %3649 = vmatprep.subr.mxu1 %v4144_v0 }
 0x334   : > { %3650 = vmatpush3.msra.mxu1 %v1653_v59  ;;  %v1847_v59 = vld [vmem:[#allocation4 + $0x330] sm:$0xff] }
 0x335   : > { %3651 = vmatprep.subr.mxu1 %v4144_v0 }
 0x336   : > { %3652 = vmatpush3.msra.mxu1 %v1652_v61  ;;  %v2048_v61 = vld [vmem:[#allocation4 + $0x3f8] sm:$0xff] }
 0x337   : > { %3653 = vmatprep.subr.mxu1 %v4144_v0 }
 0x338   : > { %3654 = vmatpush3.msra.mxu1 %v1651_v63  ;;  %v2047_v63 = vld [vmem:[#allocation4 + $0x3f0] sm:$0xff] }
 0x339   : > { %3655 = vmatprep.subr.mxu1 %v4144_v0 }
 0x33a   : > { %3656 = vmatpush3.msra.mxu1 %v1650_v2  ;;  %v1846_v2 = vld [vmem:[#allocation4 + $0x328] sm:$0xff] }
 0x33b   : > { %3657 = vmatprep.subr.mxu1 %v4144_v0 }
 0x33c   : > { %3658 = vmatpush3.msra.mxu1 %v1649_v4  ;;  %v1845_v4 = vld [vmem:[#allocation4 + $0x320] sm:$0xff] }
 0x33d   : > { %3744 = vmatprep.subr.mxu1 %v4144_v0 }
 0x3a5   : > { %v1155_v6 = vpop.f32.mrf.mxu0 }
 0x3a6   : > { %v1169_v10 = vadd.f32 %v1155_v6, %v4629_v54  ;;  %v1844_v6 = vld [vmem:[#allocation4 + $0x318] sm:$0xff] }
 0x3a7   : > { %v3433_v12 = vpop.f32.mrf.mxu0 }
 0x3a8   : > { %v1842_v12 = vld [vmem:[#allocation4 + $0x308] sm:$0xff] }
 0x3a9   : > { %v1160_v14 = vpop.f32.mrf.mxu0 }
 0x3aa   : > { %v1170_v16 = vadd.f32 %v1160_v14, %v4638_v60  ;;  %v1841_v14 = vld [vmem:[#allocation4 + $0x300] sm:$0xff] }
 0x3ab   : > { %v3436_v18 = vpop.f32.mrf.mxu0 }
 0x3ac   : > { %v2045_v18 = vld [vmem:[#allocation4 + $0x3e0] sm:$0xff] }
 0x3ad   : > { %v1165_v22 = vpop.f32.mrf.mxu0 }
 0x3ae   : > { %v1171_v23 = vadd.f32 %v1165_v22, %v4646_v8  ;;  %v2044_v22 = vld [vmem:[#allocation4 + $0x3d8] sm:$0xff] }
 0x3af   : > { %v3439_v24 = vpop.f32.mrf.mxu0 }
 0x3b0   : > { %v2042_v24 = vld [vmem:[#allocation4 + $0x3c8] sm:$0xff] }
 0x3bf   : > { %v1443_v25 = vpop.f32.mrf.mxu0 }
 0x3c0   : > { %v1347_v26 = vpop.f32.mrf.mxu1  ;;  %3584 = vmatmul.mubr.f32.vlgmr.msra.gmra.mxu0 %v1443_v25  ;;  %v2041_v25 = vld [vmem:[#allocation4 + $0x3c0] sm:$0xff] }
 0x3c1   : > { %v4772_v27 = vadd.f32 %v1347_v26, %v1169_v10  ;;  %3669 = vmatpush3.msk.msra.mxu0 %vm605_vm3, %v4357_v62  ;;  %v3544_v28 = vpop.f32.mrf.mxu0  ;;  %3586 = vmatprep.mubr.msk.f32.mxu0 %vm4145_vm0, %v4144_v0  ;;  %v1843_v10 = vld [vmem:[#allocation4 + $0x310] sm:$0xff]  ;;  %v2040_v26 = vld [vmem:[#allocation4 + $0x3b8] sm:$0xff] }
 0x3c2   : > { %3670 = vmatprep.subr.mxu0 %v4144_v0  ;;  %v3509_v54 = vpop.f32.mrf.mxu1  ;;  %v2039_v28 = vld [vmem:[#allocation4 + $0x3b0] sm:$0xff] }
 0x3c3   : > { %3671 = vmatpush3.msra.mxu0 %v4359_v1  ;;  %v1448_v60 = vpop.f32.mrf.mxu0  ;;  %v2038_v54 = vld [vmem:[#allocation4 + $0x3a8] sm:$0xff] }
 0x3c4   : > { %3672 = vmatprep.subr.mxu0 %v4144_v0  ;;  %v1352_v8 = vpop.f32.mrf.mxu1  ;;  %3587 = vmatmul.mubr.f32.gmra.mxu0 %v1448_v60  ;;  %v2037_v60 = vld [vmem:[#allocation4 + $0x3a0] sm:$0xff] }
 0x3c5   : > { %v4781_v29 = vadd.f32 %v1352_v8, %v1170_v16  ;;  %3673 = vmatpush3.msra.mxu0 %v4364_v3  ;;  %v3547_v30 = vpop.f32.mrf.mxu0  ;;  %3589 = vmatprep.mubr.msk.f32.mxu0 %vm4145_vm0, %v4144_v0  ;;  %v2046_v16 = vld [vmem:[#allocation4 + $0x3e8] sm:$0xff]  ;;  %v2036_v8 = vld [vmem:[#allocation4 + $0x398] sm:$0xff] }
 0x3c6   : > { %3674 = vmatprep.subr.mxu0 %v4144_v0  ;;  %v3512_v31 = vpop.f32.mrf.mxu1  ;;  %v2035_v30 = vld [vmem:[#allocation4 + $0x390] sm:$0xff] }
 0x3c7   : > { %3675 = vmatpush3.msra.mxu0 %v4368_v5  ;;  %v1453_v32 = vpop.f32.mrf.mxu0  ;;  %v2034_v31 = vld [vmem:[#allocation4 + $0x388] sm:$0xff] }
 0x3c8   : > { %3676 = vmatprep.subr.mxu0 %v4144_v0  ;;  %v1357_v33 = vpop.f32.mrf.mxu1  ;;  %3590 = vmatmul.mubr.f32.gmra.mxu0 %v1453_v32  ;;  %v2033_v32 = vld [vmem:[#allocation4 + $0x380] sm:$0xff] }
 0x3c9   : > { %v4789_v34 = vadd.f32 %v1357_v33, %v1171_v23  ;;  %3677 = vmatpush3.msra.mxu0 %v4372_v7  ;;  %v3550_v35 = vpop.f32.mrf.mxu0  ;;  %3694 = vmatprep.mubr.msk.f32.mxu0 %vm4145_vm0, %v4144_v0  ;;  %v2043_v23 = vld [vmem:[#allocation4 + $0x3d0] sm:$0xff] }
 0x3ca   : > { %3678 = vmatprep.subr.mxu0 %v4144_v0  ;;  %v3515_v36 = vpop.f32.mrf.mxu1 }
 0x3cb   : > { %3679 = vmatpush3.msra.mxu0 %v4376_v9 }
 0x3cc   : > { %3680 = vmatprep.subr.mxu0 %v4144_v0 }
 0x3cd   : > { %3681 = vmatpush3.msra.mxu0 %v4380_v11 }
 0x3ce   : > { %3682 = vmatprep.subr.mxu0 %v4144_v0 }
 0x3cf   : > { %3683 = vmatpush3.msra.mxu0 %v4384_v13 }
 0x3d0   : > { %3684 = vmatprep.subr.mxu0 %v4144_v0 }
 0x3d1   : > { %3685 = vmatpush3.msra.mxu0 %v4389_v15 }
 0x3d2   : > { %3686 = vmatprep.subr.mxu0 %v4144_v0 }
 0x3d3   : > { %3687 = vmatpush3.msra.mxu0 %v4394_v17 }
 0x3d4   : > { %3688 = vmatprep.subr.mxu0 %v4144_v0 }
 0x3d5   : > { %3689 = vmatpush3.msra.mxu0 %v4399_v19 }
 0x3d6   : > { %3690 = vmatprep.subr.mxu0 %v4144_v0 }
 0x3d7   : > { %3691 = vmatpush3.msra.mxu0 %v4403_v20 }
 0x3d8   : > { %3692 = vmatprep.subr.mxu0 %v4144_v0 }
 0x3d9   : > { %3693 = vmatpush3.msra.mxu0 %v4407_v21 }
 0x3da   : > { %v1635_v38 = vpop.f32.mrf.mxu1  ;;  %3695 = vmatmul.mubr.msk.f32.vlgmr.msra.gmra.mxu0 %vm595_vm4, %v2764_v37  ;;  %3703 = vmatprep.subr.mxu0 %v4144_v0 }
 0x3db   : > { %3660 = vmatmul.mubr.f32.vlgmr.msra.gmra.mxu1 %v1635_v38  ;;  %3697 = vmatprep.mubr.msk.f32.mxu0 %vm4145_vm0, %v4144_v0 }
 0x3dc   : > { %3745 = vmatpush3.msk.msra.mxu1 %vm605_vm3, %v4357_v62  ;;  %v3620_v41 = vpop.f32.mrf.mxu1  ;;  %3662 = vmatprep.mubr.msk.f32.mxu1 %vm4145_vm0, %v4144_v0 }
 0x3dd   : > { %3746 = vmatprep.subr.mxu1 %v4144_v0  ;;  %3704 = vmatpush3.msra.mxu0 %v1856_v39 }
 0x3de   : > { %3747 = vmatpush3.msra.mxu1 %v4359_v1  ;;  %v1640_v42 = vpop.f32.mrf.mxu1  ;;  %3698 = vmatmul.mubr.msk.f32.gmra.mxu0 %vm595_vm4, %v2765_v40 }
 0x3df   : > { %3748 = vmatprep.subr.mxu1 %v4144_v0  ;;  %3663 = vmatmul.mubr.f32.gmra.mxu1 %v1640_v42 }
 0x3e0   : > { %3749 = vmatpush3.msra.mxu1 %v4364_v3  ;;  %v3623_v44 = vpop.f32.mrf.mxu1  ;;  %3700 = vmatprep.mubr.msk.f32.mxu0 %vm4145_vm0, %v4144_v0 }
 0x3e1   : > { %3750 = vmatprep.subr.mxu1 %v4144_v0  ;;  %3665 = vmatprep.mubr.msk.f32.mxu1 %vm4145_vm0, %v4144_v0 }
 0x3e2   : > { %3751 = vmatpush3.msra.mxu1 %v4368_v5  ;;  %v1645_v45 = vpop.f32.mrf.mxu1  ;;  %3701 = vmatmul.mubr.msk.f32.gmra.mxu0 %vm595_vm4, %v2766_v43 }
 0x3e3   : > { %3752 = vmatprep.subr.mxu1 %v4144_v0  ;;  %3666 = vmatmul.mubr.f32.gmra.mxu1 %v1645_v45 }
 0x3e4   : > { %3753 = vmatpush3.msra.mxu1 %v4372_v7  ;;  %3770 = vmatprep.mubr.msk.f32.mxu1 %vm4145_vm0, %v4144_v0  ;;  %v3626_v47 = vpop.f32.mrf.mxu1 }
 0x3e5   : > { %3754 = vmatprep.subr.mxu1 %v4144_v0  ;;  %3705 = vmatprep.subr.mxu0 %v4144_v0 }
 0x3e6   : > { %3755 = vmatpush3.msra.mxu1 %v4376_v9  ;;  %3706 = vmatpush3.msra.mxu0 %v1855_v46 }
 0x3e7   : > { %3756 = vmatprep.subr.mxu1 %v4144_v0  ;;  %3707 = vmatprep.subr.mxu0 %v4144_v0 }
 0x3e8   : > { %3757 = vmatpush3.msra.mxu1 %v4380_v11  ;;  %3708 = vmatpush3.msra.mxu0 %v1854_v48 }
 0x3e9   : > { %3758 = vmatprep.subr.mxu1 %v4144_v0  ;;  %3709 = vmatprep.subr.mxu0 %v4144_v0 }
 0x3ea   : > { %3759 = vmatpush3.msra.mxu1 %v4384_v13  ;;  %3735 = vmatprep.mubr.msk.f32.mxu0 %vm4145_vm0, %v4144_v0 }
 0x3eb   : > { %3760 = vmatprep.subr.mxu1 %v4144_v0  ;;  %3710 = vmatpush3.msra.mxu0 %v1853_v52 }
 0x3ec   : > { %3761 = vmatpush3.msra.mxu1 %v4389_v15  ;;  %3711 = vmatprep.subr.mxu0 %v4144_v0 }
 0x3ed   : > { %3762 = vmatprep.subr.mxu1 %v4144_v0  ;;  %3712 = vmatpush3.msra.mxu0 %v1852_v53 }
 0x3ee   : > { %3763 = vmatpush3.msra.mxu1 %v4394_v17  ;;  %3713 = vmatprep.subr.mxu0 %v4144_v0 }
 0x3ef   : > { %3764 = vmatprep.subr.mxu1 %v4144_v0  ;;  %3714 = vmatpush3.msra.mxu0 %v1851_v55  ;;  %v2237_v55 = vld [vmem:[#allocation4 + $0x460] sm:$0xff] }
 0x3f0   : > { %3765 = vmatpush3.msra.mxu1 %v4399_v19  ;;  %3715 = vmatprep.subr.mxu0 %v4144_v0 }
 0x3f1   : > { %3766 = vmatprep.subr.mxu1 %v4144_v0  ;;  %3716 = vmatpush3.msra.mxu0 %v1850_v56  ;;  %v2236_v56 = vld [vmem:[#allocation4 + $0x458] sm:$0xff] }
 0x3f2   : > { %3767 = vmatpush3.msra.mxu1 %v4403_v20  ;;  %3717 = vmatprep.subr.mxu0 %v4144_v0 }
 0x3f3   : > { %3768 = vmatprep.subr.mxu1 %v4144_v0  ;;  %3718 = vmatpush3.msra.mxu0 %v1849_v57  ;;  %v2235_v57 = vld [vmem:[#allocation4 + $0x450] sm:$0xff] }
 0x3f4   : > { %3769 = vmatpush3.msra.mxu1 %v4407_v21  ;;  %3719 = vmatprep.subr.mxu0 %v4144_v0 }
 0x3f5   : > { %3771 = vmatmul.mubr.msk.f32.vlgmr.msra.gmra.mxu1 %vm595_vm4, %v2771_v49  ;;  %3779 = vmatprep.subr.mxu1 %v4144_v0 }
 0x3f6   : > { %3773 = vmatprep.mubr.msk.f32.mxu1 %vm4145_vm0, %v4144_v0  ;;  %3720 = vmatpush3.msra.mxu0 %v1848_v58  ;;  %v2234_v58 = vld [vmem:[#allocation4 + $0x448] sm:$0xff] }
 0x3f7   : > { %3780 = vmatpush3.msra.mxu1 %v2048_v61  ;;  %3721 = vmatprep.subr.mxu0 %v4144_v0  ;;  %v2232_v61 = vld [vmem:[#allocation4 + $0x438] sm:$0xff] }
 0x3f8   : > { %3781 = vmatprep.subr.mxu1 %v4144_v0  ;;  %3722 = vmatpush3.msra.mxu0 %v1847_v59  ;;  %v2233_v59 = vld [vmem:[#allocation4 + $0x440] sm:$0xff] }
 0x3f9   : > { %3774 = vmatmul.mubr.msk.f32.gmra.mxu1 %vm595_vm4, %v2772_v50  ;;  %3723 = vmatprep.subr.mxu0 %v4144_v0 }
 0x3fa   : > { %3776 = vmatprep.mubr.msk.f32.mxu1 %vm4145_vm0, %v4144_v0  ;;  %3782 = vmatpush3.msra.mxu1 %v2047_v63  ;;  %v2231_v63 = vld [vmem:[#allocation4 + $0x430] sm:$0xff] }
 0x3fb   : > { %3783 = vmatprep.subr.mxu1 %v4144_v0  ;;  %3724 = vmatpush3.msra.mxu0 %v1846_v2  ;;  %v2230_v2 = vld [vmem:[#allocation4 + $0x428] sm:$0xff] }
 0x3fc   : > { %3725 = vmatprep.subr.mxu0 %v4144_v0  ;;  %3784 = vmatpush3.msra.mxu1 %v2046_v16  ;;  %v2350_v16 = vld [vmem:[#allocation6 + $0x78] sm:$0xff] }
 0x3fd   : > { %3777 = vmatmul.mubr.msk.f32.gmra.mxu1 %vm595_vm4, %v2773_v51  ;;  %3726 = vmatpush3.msra.mxu0 %v1845_v4  ;;  %v2229_v4 = vld [vmem:[#allocation4 + $0x420] sm:$0xff] }
 0x3fe   : > { %3811 = vmatprep.mubr.msk.f32.mxu1 %vm4145_vm0, %v4144_v0  ;;  %3727 = vmatprep.subr.mxu0 %v4144_v0 }
 0x3ff   : > { %3728 = vmatpush3.msra.mxu0 %v1844_v6  ;;  %3785 = vmatprep.subr.mxu1 %v4144_v0  ;;  %v2228_v6 = vld [vmem:[#allocation4 + $0x418] sm:$0xff] }
 0x400   : > { %3729 = vmatprep.subr.mxu0 %v4144_v0  ;;  %3786 = vmatpush3.msra.mxu1 %v2045_v18  ;;  %v2349_v18 = vld [vmem:[#allocation6 + $0x70] sm:$0xff] }
 0x401   : > { %3730 = vmatpush3.msra.mxu0 %v1843_v10  ;;  %3787 = vmatprep.subr.mxu1 %v4144_v0  ;;  %v2227_v10 = vld [vmem:[#allocation4 + $0x410] sm:$0xff] }
 0x402   : > { %3731 = vmatprep.subr.mxu0 %v4144_v0  ;;  %3788 = vmatpush3.msra.mxu1 %v2044_v22  ;;  %v2348_v22 = vld [vmem:[#allocation6 + $0x68] sm:$0xff] }
 0x403   : > { %3732 = vmatpush3.msra.mxu0 %v1842_v12  ;;  %3789 = vmatprep.subr.mxu1 %v4144_v0  ;;  %v2226_v12 = vld [vmem:[#allocation4 + $0x408] sm:$0xff] }
 0x404   : > { %3733 = vmatprep.subr.mxu0 %v4144_v0  ;;  %3790 = vmatpush3.msra.mxu1 %v2043_v23  ;;  %v2347_v23 = vld [vmem:[#allocation6 + $0x60] sm:$0xff] }
 0x405   : > { %3734 = vmatpush3.msra.mxu0 %v1841_v14  ;;  %3791 = vmatprep.subr.mxu1 %v4144_v0  ;;  %v2225_v14 = vld [vmem:[#allocation4 + $0x400] sm:$0xff] }
 0x406   : > { %3820 = vmatprep.subr.mxu0 %v4144_v0  ;;  %3792 = vmatpush3.msra.mxu1 %v2042_v24  ;;  %v2346_v24 = vld [vmem:[#allocation6 + $0x58] sm:$0xff] }
 0x407   : > { %3793 = vmatprep.subr.mxu1 %v4144_v0 }
 0x408   : > { %3794 = vmatpush3.msra.mxu1 %v2041_v25  ;;  %v2345_v25 = vld [vmem:[#allocation6 + $0x50] sm:$0xff] }
 0x409   : > { %3795 = vmatprep.subr.mxu1 %v4144_v0 }
 0x40a   : > { %3796 = vmatpush3.msra.mxu1 %v2040_v26  ;;  %v2344_v26 = vld [vmem:[#allocation6 + $0x48] sm:$0xff] }
 0x40b   : > { %3797 = vmatprep.subr.mxu1 %v4144_v0 }
 0x40c   : > { %3798 = vmatpush3.msra.mxu1 %v2039_v28  ;;  %v2343_v28 = vld [vmem:[#allocation6 + $0x40] sm:$0xff] }
 0x40d   : > { %3799 = vmatprep.subr.mxu1 %v4144_v0 }
 0x40e   : > { %3800 = vmatpush3.msra.mxu1 %v2038_v54  ;;  %v2342_v54 = vld [vmem:[#allocation6 + $0x38] sm:$0xff] }
 0x40f   : > { %3801 = vmatprep.subr.mxu1 %v4144_v0 }
 0x410   : > { %3802 = vmatpush3.msra.mxu1 %v2037_v60  ;;  %v2341_v60 = vld [vmem:[#allocation6 + $0x30] sm:$0xff] }
 0x411   : > { %3803 = vmatprep.subr.mxu1 %v4144_v0 }
 0x412   : > { %3804 = vmatpush3.msra.mxu1 %v2036_v8  ;;  %v2340_v8 = vld [vmem:[#allocation6 + $0x28] sm:$0xff] }
 0x413   : > { %3805 = vmatprep.subr.mxu1 %v4144_v0 }
 0x414   : > { %3806 = vmatpush3.msra.mxu1 %v2035_v30  ;;  %v2339_v30 = vld [vmem:[#allocation6 + $0x20] sm:$0xff] }
 0x415   : > { %3807 = vmatprep.subr.mxu1 %v4144_v0 }
 0x416   : > { %3808 = vmatpush3.msra.mxu1 %v2034_v31  ;;  %v2338_v31 = vld [vmem:[#allocation6 + $0x18] sm:$0xff] }
 0x417   : > { %3809 = vmatprep.subr.mxu1 %v4144_v0 }
 0x418   : > { %3810 = vmatpush3.msra.mxu1 %v2033_v32  ;;  %v2337_v32 = vld [vmem:[#allocation6 + $0x10] sm:$0xff] }
 0x419   : > { %3896 = vmatprep.subr.mxu1 %v4144_v0 }
 0x480   : > { %v1539_v33 = vpop.f32.mrf.mxu0 }
 0x481   : > { %v1553_v35 = vadd.f32 %v1539_v33, %v4772_v27 }
 0x482   : > { %v3585_v36 = vpop.f32.mrf.mxu0 }
 0x484   : > { %v1544_v37 = vpop.f32.mrf.mxu0 }
 0x485   : > { %v1554_v38 = vadd.f32 %v1544_v37, %v4781_v29 }
 0x486   : > { %v3588_v39 = vpop.f32.mrf.mxu0 }
 0x488   : > { %v1549_v40 = vpop.f32.mrf.mxu0 }
 0x489   : > { %v1555_v41 = vadd.f32 %v1549_v40, %v4789_v34 }
 0x48a   : > { %v3591_v42 = vpop.f32.mrf.mxu0 }
 0x49a   : > { %v1827_v43 = vpop.f32.mrf.mxu0 }
 0x49b   : > { %v1731_v44 = vpop.f32.mrf.mxu1  ;;  %3736 = vmatmul.mubr.f32.vlgmr.msra.gmra.mxu0 %v1827_v43  ;;  %v2437_v43 = vld [vmem:[#allocation6 + $0xf8] sm:$0xff] }
 0x49c   : > { %v4915_v45 = vadd.f32 %v1731_v44, %v1553_v35  ;;  %3821 = vmatpush3.msk.msra.mxu0 %vm605_vm3, %v4357_v62  ;;  %v3696_v46 = vpop.f32.mrf.mxu0  ;;  %3738 = vmatprep.mubr.msk.f32.mxu0 %vm4145_vm0, %v4144_v0 }
 0x49d   : > { %3822 = vmatprep.subr.mxu0 %v4144_v0  ;;  %v3661_v27 = vpop.f32.mrf.mxu1 }
 0x49e   : > { %3823 = vmatpush3.msra.mxu0 %v4359_v1  ;;  %v1832_v29 = vpop.f32.mrf.mxu0  ;;  %v2436_v27 = vld [vmem:[#allocation6 + $0xf0] sm:$0xff] }
 0x49f   : > { %3824 = vmatprep.subr.mxu0 %v4144_v0  ;;  %v1736_v34 = vpop.f32.mrf.mxu1  ;;  %3739 = vmatmul.mubr.f32.gmra.mxu0 %v1832_v29 }
 0x4a0   : > { %v4924_v47 = vadd.f32 %v1736_v34, %v1554_v38  ;;  %3825 = vmatpush3.msra.mxu0 %v4364_v3  ;;  %v3699_v48 = vpop.f32.mrf.mxu0  ;;  %3741 = vmatprep.mubr.msk.f32.mxu0 %vm4145_vm0, %v4144_v0 }
 0x4a1   : > { %3826 = vmatprep.subr.mxu0 %v4144_v0  ;;  %v3664_v62 = vpop.f32.mrf.mxu1 }
 0x4a2   : > { %3827 = vmatpush3.msra.mxu0 %v4368_v5  ;;  %v1837_v49 = vpop.f32.mrf.mxu0  ;;  %v2778_v5 = vld [vmem:[%s5071_s3 + $0xc0] sm:$0xff] }
 0x4a3   : > { %3828 = vmatprep.subr.mxu0 %v4144_v0  ;;  %v1741_v1 = vpop.f32.mrf.mxu1  ;;  %3742 = vmatmul.mubr.f32.gmra.mxu0 %v1837_v49  ;;  %v2434_v49 = vld [vmem:[#allocation6 + $0xe0] sm:$0xff] }
 0x4a4   : > { %v4932_v50 = vadd.f32 %v1741_v1, %v1555_v41  ;;  %3829 = vmatpush3.msra.mxu0 %v4372_v7  ;;  %v3702_v51 = vpop.f32.mrf.mxu0  ;;  %3846 = vmatprep.mubr.msk.f32.mxu0 %vm4145_vm0, %v4144_v0  ;;  %v2240_v7 = vld [vmem:[#allocation4 + $0x478] sm:$0xff] }
 0x4a5   : > { %3830 = vmatprep.subr.mxu0 %v4144_v0  ;;  %v3667_v3 = vpop.f32.mrf.mxu1 }
 0x4a6   : > { %3831 = vmatpush3.msra.mxu0 %v4376_v9  ;;  %v2433_v3 = vld [vmem:[#allocation6 + $0xd8] sm:$0xff] }
 0x4a7   : > { %3832 = vmatprep.subr.mxu0 %v4144_v0 }
 0x4a8   : > { %3833 = vmatpush3.msra.mxu0 %v4380_v11  ;;  %v2779_v11 = vld [vmem:[%s5071_s3 + $0xc8] sm:$0xff] }
 0x4a9   : > { %3834 = vmatprep.subr.mxu0 %v4144_v0 }
 0x4aa   : > { %3835 = vmatpush3.msra.mxu0 %v4384_v13 }
 0x4ab   : > { %3836 = vmatprep.subr.mxu0 %v4144_v0 }
 0x4ac   : > { %3837 = vmatpush3.msra.mxu0 %v4389_v15  ;;  %v2239_v15 = vld [vmem:[#allocation4 + $0x470] sm:$0xff] }
 0x4ad   : > { %3838 = vmatprep.subr.mxu0 %v4144_v0 }
 0x4ae   : > { %3839 = vmatpush3.msra.mxu0 %v4394_v17 }
 0x4af   : > { %3840 = vmatprep.subr.mxu0 %v4144_v0 }
 0x4b0   : > { %3841 = vmatpush3.msra.mxu0 %v4399_v19  ;;  %v2780_v19 = vld [vmem:[%s5071_s3 + $0xd0] sm:$0x3] }
 0x4b1   : > { %3842 = vmatprep.subr.mxu0 %v4144_v0 }
 0x4b2   : > { %3843 = vmatpush3.msra.mxu0 %v4403_v20 }
 0x4b3   : > { %3844 = vmatprep.subr.mxu0 %v4144_v0 }
 0x4b4   : > { %3845 = vmatpush3.msra.mxu0 %v4407_v21  ;;  %v2238_v21 = vld [vmem:[#allocation4 + $0x468] sm:$0xff] }
 0x4b5   : > { %v2019_v9 = vpop.f32.mrf.mxu1  ;;  %3847 = vmatmul.mubr.msk.f32.vlgmr.msra.gmra.mxu0 %vm595_vm4, %v2778_v5  ;;  %3855 = vmatprep.subr.mxu0 %v4144_v0 }
 0x4b6   : > { %3812 = vmatmul.mubr.f32.vlgmr.msra.gmra.mxu1 %v2019_v9  ;;  %3849 = vmatprep.mubr.msk.f32.mxu0 %vm4145_vm0, %v4144_v0  ;;  %v2432_v9 = vld [vmem:[#allocation6 + $0xd0] sm:$0xff] }
 0x4b7   : > { %v3772_v13 = vpop.f32.mrf.mxu1  ;;  %3814 = vmatprep.mubr.msk.f32.mxu1 %vm4145_vm0, %v4144_v0  ;;  %3856 = vmatpush3.msra.mxu0 %v2240_v7 }
 0x4b8   : > { %3857 = vmatprep.subr.mxu0 %v4144_v0  ;;  %3897 = vmatpush3.msra.mxu1 %v2350_v16  ;;  %v2529_v16 = vld [vmem:[#allocation6 + $0x170] sm:$0xff] }
 0x4b9   : > { %v2024_v17 = vpop.f32.mrf.mxu1  ;;  %3850 = vmatmul.mubr.msk.f32.gmra.mxu0 %vm595_vm4, %v2779_v11  ;;  %3898 = vmatprep.subr.mxu1 %v4144_v0 }
 0x4ba   : > { %3815 = vmatmul.mubr.f32.gmra.mxu1 %v2024_v17  ;;  %3852 = vmatprep.mubr.msk.f32.mxu0 %vm4145_vm0, %v4144_v0 }
 0x4bb   : > { %v3775_v20 = vpop.f32.mrf.mxu1  ;;  %3817 = vmatprep.mubr.msk.f32.mxu1 %vm4145_vm0, %v4144_v0  ;;  %3858 = vmatpush3.msra.mxu0 %v2239_v15  ;;  %v2431_v15 = vld [vmem:[#allocation6 + $0xc8] sm:$0xff] }
 0x4bc   : > { %3859 = vmatprep.subr.mxu0 %v4144_v0  ;;  %3899 = vmatpush3.msra.mxu1 %v2349_v18  ;;  %v2429_v20 = vld [vmem:[#allocation6 + $0xb8] sm:$0xff] }
 0x4bd   : > { %v2029_v52 = vpop.f32.mrf.mxu1  ;;  %3853 = vmatmul.mubr.msk.f32.gmra.mxu0 %vm595_vm4, %v2780_v19  ;;  %3900 = vmatprep.subr.mxu1 %v4144_v0  ;;  %v2430_v19 = vld [vmem:[#allocation6 + $0xc0] sm:$0xff] }
 0x4be   : > { %3818 = vmatmul.mubr.f32.gmra.mxu1 %v2029_v52  ;;  %3860 = vmatpush3.msra.mxu0 %v2238_v21  ;;  %v2428_v21 = vld [vmem:[#allocation6 + $0xb0] sm:$0xff]  ;;  %v2336_v52 = vld [vmem:[#allocation6 + $0x8] sm:$0xff] }
 0x4bf   : > { %3861 = vmatprep.subr.mxu0 %v4144_v0  ;;  %v3778_v53 = vpop.f32.mrf.mxu1  ;;  %3887 = vmatprep.mubr.msk.f32.mxu0 %vm4145_vm0, %v4144_v0 }
 0x4c0   : > { %3928 = vmatprep.mubr.msk.f32.mxu1 %vm4145_vm0, %v4144_v0  ;;  %3862 = vmatpush3.msra.mxu0 %v2237_v55  ;;  %v2427_v53 = vld [vmem:[#allocation6 + $0xa8] sm:$0xff]  ;;  %v2335_v55 = vld [vmem:[#allocation6] sm:$0xff] }
 0x4c1   : > { %3863 = vmatprep.subr.mxu0 %v4144_v0  ;;  %3901 = vmatpush3.msra.mxu1 %v2348_v22 }
 0x4c2   : > { %3864 = vmatpush3.msra.mxu0 %v2236_v56  ;;  %3902 = vmatprep.subr.mxu1 %v4144_v0  ;;  %v2426_v56 = vld [vmem:[#allocation6 + $0xa0] sm:$0xff] }
 0x4c3   : > { %3865 = vmatprep.subr.mxu0 %v4144_v0  ;;  %3903 = vmatpush3.msra.mxu1 %v2347_v23  ;;  %v2528_v23 = vld [vmem:[#allocation6 + $0x168] sm:$0xff] }
 0x4c4   : > { %3866 = vmatpush3.msra.mxu0 %v2235_v57  ;;  %3904 = vmatprep.subr.mxu1 %v4144_v0  ;;  %v2425_v57 = vld [vmem:[#allocation6 + $0x98] sm:$0xff] }
 0x4c5   : > { %3867 = vmatprep.subr.mxu0 %v4144_v0  ;;  %3905 = vmatpush3.msra.mxu1 %v2346_v24 }
 0x4c6   : > { %3868 = vmatpush3.msra.mxu0 %v2234_v58  ;;  %3906 = vmatprep.subr.mxu1 %v4144_v0  ;;  %v2424_v58 = vld [vmem:[#allocation6 + $0x90] sm:$0xff] }
 0x4c7   : > { %3869 = vmatprep.subr.mxu0 %v4144_v0  ;;  %3907 = vmatpush3.msra.mxu1 %v2345_v25 }
 0x4c8   : > { %3870 = vmatpush3.msra.mxu0 %v2233_v59  ;;  %3908 = vmatprep.subr.mxu1 %v4144_v0  ;;  %v2423_v59 = vld [vmem:[#allocation6 + $0x88] sm:$0xff] }
 0x4c9   : > { %3871 = vmatprep.subr.mxu0 %v4144_v0  ;;  %3909 = vmatpush3.msra.mxu1 %v2344_v26 }
 0x4ca   : > { %3872 = vmatpush3.msra.mxu0 %v2232_v61  ;;  %3910 = vmatprep.subr.mxu1 %v4144_v0  ;;  %v2422_v61 = vld [vmem:[#allocation6 + $0x80] sm:$0xff] }
 0x4cb   : > { %3873 = vmatprep.subr.mxu0 %v4144_v0  ;;  %3911 = vmatpush3.msra.mxu1 %v2343_v28 }
 0x4cc   : > { %3874 = vmatpush3.msra.mxu0 %v2231_v63  ;;  %3912 = vmatprep.subr.mxu1 %v4144_v0 }
 0x4cd   : > { %3875 = vmatprep.subr.mxu0 %v4144_v0  ;;  %3913 = vmatpush3.msra.mxu1 %v2342_v54  ;;  %v2527_v54 = vld [vmem:[#allocation6 + $0x160] sm:$0xff] }
 0x4ce   : > { %3876 = vmatpush3.msra.mxu0 %v2230_v2  ;;  %3914 = vmatprep.subr.mxu1 %v4144_v0 }
 0x4cf   : > { %3877 = vmatprep.subr.mxu0 %v4144_v0  ;;  %3915 = vmatpush3.msra.mxu1 %v2341_v60 }
 0x4d0   : > { %3878 = vmatpush3.msra.mxu0 %v2229_v4  ;;  %3916 = vmatprep.subr.mxu1 %v4144_v0 }
 0x4d1   : > { %3879 = vmatprep.subr.mxu0 %v4144_v0  ;;  %3917 = vmatpush3.msra.mxu1 %v2340_v8 }
 0x4d2   : > { %3880 = vmatpush3.msra.mxu0 %v2228_v6  ;;  %3918 = vmatprep.subr.mxu1 %v4144_v0 }
 0x4d3   : > { %3881 = vmatprep.subr.mxu0 %v4144_v0  ;;  %3919 = vmatpush3.msra.mxu1 %v2339_v30 }
 0x4d4   : > { %3882 = vmatpush3.msra.mxu0 %v2227_v10  ;;  %3920 = vmatprep.subr.mxu1 %v4144_v0  ;;  %v2530_v10 = vld [vmem:[#allocation6 + $0x178] sm:$0xff] }
 0x4d5   : > { %3883 = vmatprep.subr.mxu0 %v4144_v0  ;;  %3921 = vmatpush3.msra.mxu1 %v2338_v31  ;;  %v2526_v31 = vld [vmem:[#allocation6 + $0x158] sm:$0xff] }
 0x4d6   : > { %3884 = vmatpush3.msra.mxu0 %v2226_v12  ;;  %3922 = vmatprep.subr.mxu1 %v4144_v0 }
 0x4d7   : > { %3885 = vmatprep.subr.mxu0 %v4144_v0  ;;  %3923 = vmatpush3.msra.mxu1 %v2337_v32 }
 0x4d8   : > { %3886 = vmatpush3.msra.mxu0 %v2225_v14  ;;  %3924 = vmatprep.subr.mxu1 %v4144_v0 }
 0x4d9   : > { %3931 = vmatprep.subr.mxu0 %v4144_v0  ;;  %3925 = vmatpush3.msra.mxu1 %v2336_v52 }
 0x4da   : > { %3926 = vmatprep.subr.mxu1 %v4144_v0 }
 0x4db   : > { %3927 = vmatpush3.msra.mxu1 %v2335_v55 }
 0x4dc   : > { %3966 = vmatprep.subr.mxu1 %v4144_v0 }
 0x55b   : > { %v1923_v33 = vpop.f32.mrf.mxu0 }
 0x55c   : > { %v1937_v35 = vadd.f32 %v1923_v33, %v4915_v45 }
 0x55d   : > { %v3737_v36 = vpop.f32.mrf.mxu0 }
 0x55e   : > { %v2524_v36 = vld [vmem:[#allocation6 + $0x148] sm:$0xff] }
 0x55f   : > { %v1928_v37 = vpop.f32.mrf.mxu0 }
 0x560   : > { %v1938_v38 = vadd.f32 %v1928_v37, %v4924_v47  ;;  %v2435_v47 = vld [vmem:[#allocation6 + $0xe8] sm:$0xff] }
 0x561   : > { %v3740_v39 = vpop.f32.mrf.mxu0 }
 0x562   : > { %v2522_v39 = vld [vmem:[#allocation6 + $0x138] sm:$0xff] }
 0x563   : > { %v1933_v40 = vpop.f32.mrf.mxu0 }
 0x564   : > { %v1939_v41 = vadd.f32 %v1933_v40, %v4932_v50  ;;  %v2521_v40 = vld [vmem:[#allocation6 + $0x130] sm:$0xff] }
 0x565   : > { %v3743_v42 = vpop.f32.mrf.mxu0 }
 0x566   : > { %v2519_v42 = vld [vmem:[#allocation6 + $0x120] sm:$0xff] }
 0x575   : > { %v2211_v44 = vpop.f32.mrf.mxu0 }
 0x576   : > { %v2115_v46 = vpop.f32.mrf.mxu1  ;;  %3888 = vmatmul.mubr.f32.vlgmr.msra.gmra.mxu0 %v2211_v44  ;;  %v2517_v44 = vld [vmem:[#allocation6 + $0x110] sm:$0xff] }
 0x577   : > { %v5011_v29 = vadd.f32 %v2115_v46, %v1937_v35  ;;  %v3848_v34 = vpop.f32.mrf.mxu0  ;;  %3890 = vmatprep.mubr.msk.f32.mxu0 %vm4145_vm0, %v4144_v0  ;;  %3932 = vmatpush3.msra.mxu0 %v2437_v43  ;;  %v2525_v35 = vld [vmem:[#allocation6 + $0x150] sm:$0xff]  ;;  %v2518_v43 = vld [vmem:[#allocation6 + $0x118] sm:$0xff]  ;;  %v2516_v46 = vld [vmem:[#allocation6 + $0x108] sm:$0xff] }
 0x578   : > { %v3813_v45 = vpop.f32.mrf.mxu1  ;;  %3933 = vmatprep.subr.mxu0 %v4144_v0 }
 0x579   : > { %v2216_v48 = vpop.f32.mrf.mxu0  ;;  %3934 = vmatpush3.msra.mxu0 %v2436_v27  ;;  %v2515_v27 = vld [vmem:[#allocation6 + $0x100] sm:$0xff] }
 0x57a   : > { %v2120_v62 = vpop.f32.mrf.mxu1  ;;  %3891 = vmatmul.mubr.f32.gmra.mxu0 %v2216_v48  ;;  %3935 = vmatprep.subr.mxu0 %v4144_v0  ;;  %v2785_v48 = vld [vmem:[%s5075_s7] ss:$0 sm:$0xff] }
 0x57b   : > { %v2130_v1 = vadd.f32 %v2120_v62, %v1938_v38  ;;  %v3851_v50 = vpop.f32.mrf.mxu0  ;;  %3893 = vmatprep.mubr.msk.f32.mxu0 %vm4145_vm0, %v4144_v0  ;;  %3936 = vmatpush3.msra.mxu0 %v2435_v47  ;;  %v2523_v38 = vld [vmem:[#allocation6 + $0x140] sm:$0xff] }
 0x57c   : > { %v3816_v51 = vpop.f32.mrf.mxu1  ;;  %3937 = vmatprep.subr.mxu0 %v4144_v0 }
 0x57d   : > { %v2221_v5 = vpop.f32.mrf.mxu0  ;;  %3938 = vmatpush3.msra.mxu0 %v2434_v49  ;;  %v2609_v51 = vld [vmem:[%s5076_s8] sm:$0x3f] }
 0x57e   : > { %v2125_v7 = vpop.f32.mrf.mxu1  ;;  %3894 = vmatmul.mubr.f32.gmra.mxu0 %v2221_v5  ;;  %3939 = vmatprep.subr.mxu0 %v4144_v0 }
 0x57f   : > { %v2131_v11 = vadd.f32 %v2125_v7, %v1939_v41  ;;  %v3854_v13 = vpop.f32.mrf.mxu0  ;;  %3940 = vmatpush3.msra.mxu0 %v2433_v3  ;;  %3963 = vmatprep.mubr.msk.f32.mxu0 %vm4145_vm0, %v4144_v0  ;;  %v2520_v41 = vld [vmem:[#allocation6 + $0x128] sm:$0xff] }
 0x580   : > { %3941 = vmatprep.subr.mxu0 %v4144_v0  ;;  %v3819_v17 = vpop.f32.mrf.mxu1 }
 0x581   : > { %3942 = vmatpush3.msra.mxu0 %v2432_v9 }
 0x582   : > { %3943 = vmatprep.subr.mxu0 %v4144_v0 }
 0x583   : > { %3944 = vmatpush3.msra.mxu0 %v2431_v15 }
 0x584   : > { %3945 = vmatprep.subr.mxu0 %v4144_v0 }
 0x585   : > { %3946 = vmatpush3.msra.mxu0 %v2430_v19 }
 0x586   : > { %3947 = vmatprep.subr.mxu0 %v4144_v0 }
 0x587   : > { %3948 = vmatpush3.msra.mxu0 %v2429_v20 }
 0x588   : > { %3949 = vmatprep.subr.mxu0 %v4144_v0 }
 0x589   : > { %3950 = vmatpush3.msra.mxu0 %v2428_v21 }
 0x58a   : > { %3951 = vmatprep.subr.mxu0 %v4144_v0 }
 0x58b   : > { %3952 = vmatpush3.msra.mxu0 %v2427_v53 }
 0x58c   : > { %3953 = vmatprep.subr.mxu0 %v4144_v0 }
 0x58d   : > { %3954 = vmatpush3.msra.mxu0 %v2426_v56 }
 0x58e   : > { %3955 = vmatprep.subr.mxu0 %v4144_v0 }
 0x58f   : > { %3956 = vmatpush3.msra.mxu0 %v2425_v57 }
 0x590   : > { %3957 = vmatprep.subr.mxu0 %v4144_v0 }
 0x591   : > { %3958 = vmatpush3.msra.mxu0 %v2424_v58 }
 0x592   : > { %3959 = vmatprep.subr.mxu0 %v4144_v0 }
 0x593   : > { %3960 = vmatpush3.msra.mxu0 %v2423_v59 }
 0x594   : > { %3961 = vmatprep.subr.mxu0 %v4144_v0 }
 0x595   : > { %3962 = vmatpush3.msra.mxu0 %v2422_v61 }
 0x636   : > { %v2307_v63 = vpop.f32.mrf.mxu0 }
 0x637   : > { %v2321_v2 = vadd.f32 %v2307_v63, %v5011_v29 }
 0x638   : > { %v3889_v4 = vpop.f32.mrf.mxu0 }
 0x639   : > { %v2324_v6 = vmax.f32 %v2321_v2, 0.0 }
 0x63a   : > { %v2312_v12 = vpop.f32.mrf.mxu0 }
 0x63b   : > { %v2322_v14 = vadd.f32 %v2312_v12, %v2130_v1  ;;  %3929 = vmatmul.mubr.f32.vlgmr.msra.gmra.mxu1 %v2324_v6  ;;  %v2440_v25 = vrot.slane %v2324_v6, 6 }
 0x63c   : > { %3967 = vmatpush3.msra.mxu1 %v2530_v10  ;;  %v3892_v18 = vpop.f32.mrf.mxu0  ;;  %3998 = vmatprep.mubr.msk.f32.mxu1 %vm4145_vm0, %v4144_v0 }
 0x63d   : > { %v2325_v22 = vmax.f32 %v2322_v14, 0.0  ;;  %3968 = vmatprep.subr.mxu1 %v4144_v0 }
 0x63e   : > { %3969 = vmatpush3.msra.mxu1 %v2529_v16  ;;  %v2317_v24 = vpop.f32.mrf.mxu0 }
 0x63f   : > { %v2441_v26 = vrot.slane %v2325_v22, 6  ;;  %v2323_v28 = vadd.f32 %v2317_v24, %v2131_v11  ;;  %3970 = vmatprep.subr.mxu1 %v4144_v0  ;;  %v2533_v32 = vrot.slane %v2325_v22, 4 }
 0x640   : > { %3971 = vmatpush3.msra.mxu1 %v2528_v23  ;;  %v3895_v60 = vpop.f32.mrf.mxu0 }
 0x641   : > { %v2326_v8 = vmax.f32 %v2323_v28, 0.0  ;;  %3972 = vmatprep.subr.mxu1 %v4144_v0  ;;  %v2442_v30 = vsel %vm605_vm3, %v2440_v25, %v2441_v26 }
 0x642   : > { %3973 = vmatpush3.msra.mxu1 %v2527_v54  ;;  %3964 = vmatmul.mubr.f32.vlgmr.msra.gmra.mxu0 %v2442_v30 }
 0x643   : > { %v2534_v33 = vrot.slane %v2326_v8, 4  ;;  %3974 = vmatprep.subr.mxu1 %v4144_v0 }
 0x644   : > { %3975 = vmatpush3.msra.mxu1 %v2526_v31 }
 0x645   : > { %3976 = vmatprep.subr.mxu1 %v4144_v0  ;;  %v2535_v37 = vsel %vm2532_vm5, %v2533_v32, %v2534_v33 }
 0x646   : > { %3977 = vmatpush3.msra.mxu1 %v2525_v35 }
 0x647   : > { %3978 = vmatprep.subr.mxu1 %v4144_v0 }
 0x648   : > { %3979 = vmatpush3.msra.mxu1 %v2524_v36 }
 0x649   : > { %3980 = vmatprep.subr.mxu1 %v4144_v0 }
 0x64a   : > { %3981 = vmatpush3.msra.mxu1 %v2523_v38 }
 0x64b   : > { %3982 = vmatprep.subr.mxu1 %v4144_v0 }
 0x64c   : > { %3983 = vmatpush3.msra.mxu1 %v2522_v39 }
 0x64d   : > { %3984 = vmatprep.subr.mxu1 %v4144_v0 }
 0x64e   : > { %3985 = vmatpush3.msra.mxu1 %v2521_v40 }
 0x64f   : > { %3986 = vmatprep.subr.mxu1 %v4144_v0 }
 0x650   : > { %3987 = vmatpush3.msra.mxu1 %v2520_v41 }
 0x651   : > { %3988 = vmatprep.subr.mxu1 %v4144_v0 }
 0x652   : > { %3989 = vmatpush3.msra.mxu1 %v2519_v42 }
 0x653   : > { %3990 = vmatprep.subr.mxu1 %v4144_v0 }
 0x654   : > { %3991 = vmatpush3.msra.mxu1 %v2518_v43 }
 0x655   : > { %3992 = vmatprep.subr.mxu1 %v4144_v0 }
 0x656   : > { %3993 = vmatpush3.msra.mxu1 %v2517_v44 }
 0x657   : > { %3994 = vmatprep.subr.mxu1 %v4144_v0 }
 0x658   : > { %3995 = vmatpush3.msra.mxu1 %v2516_v46 }
 0x659   : > { %3996 = vmatprep.subr.mxu1 %v4144_v0 }
 0x65a   : > { %3997 = vmatpush3.msra.mxu1 %v2515_v27 }
 0x65b   : > { %3999 = vmatmul.mubr.f32.vlgmr.msra.gmra.mxu1 %v2535_v37 }
 0x6fb   : > { %v2417_v29 = vpop.f32.mrf.mxu1 }
 0x6fc   : > { %v2421_v62 = vadd.f32 %v2785_v48, %v2417_v29 }
 0x6fd   : > { %v3930_v34 = vpop.f32.mrf.mxu1 }
 0x702   : > { %v2510_v45 = vpop.f32.mrf.mxu0 }
 0x703   : > { %v2514_v49 = vadd.f32 %v2510_v45, %v2421_v62 }
 0x704   : > { %v3965_v47 = vpop.f32.mrf.mxu0 }
 0x71b   : > { %v2603_v1 = vpop.f32.mrf.mxu1 }
 0x71c   : > { %v2607_v50 = vadd.f32 %v2603_v1, %v2514_v49 }
 0x71d   : > { %v4000_v0 = vpop.f32.mrf.mxu1 }
 0x71e   : > { %v2608_v3 = vmul.f32 11.313708, %v2607_v50 }
 0x720   : > { %v2610_v5 = vadd.f32 %v2609_v51, %v2608_v3 }
 0x722   : > { %2611 = vst [vmem:[%s374_s23] sm:$0x3f] %v2610_v5 }
 0x723 PF: > { %s21_s30 = sadd.s32 1, %s4137_s30  }
 0x724   : > { %p18_p2 = scmp.ge.s32.totalorder %s21_s30, 4  }
 0x726   :  { %20 = sbr.rel (!%p18_p2) target bundleno = 2 (0x2), region = 107 }
 0x72b   :  { %2631 = vsyncpa [#allocation3], 1 }
 0x72c   :  { %2633 = vsyncpa [#allocation3 + $0x1], 1 }
 0x72d   :  { %2634 = vsyncpa [#allocation5], 1 }

</bundles_post_ra>
